<compile_context>
chip_gen: v6e
topology: v6e:2x2x1
jax: 0.10.0
libtpu: 0.0.40
codegen_flags: <defaults>
</compile_context>

<pallas_src>
import functools

import jax
import jax.numpy as jnp
import numpy as np
from jax.experimental import pallas as pl
from jax.experimental.pallas import tpu as pltpu


# ----------------------------------------------------------------------------
# Fused Pallas kernel: fc1 -> L x LSTM -> fc2
# ----------------------------------------------------------------------------
def _recurrent_kernel(
    s_ref,       # [T*B, D]   time-major rows (t major, b minor)
    w1_ref,      # [D, H]     fc1 weight (transposed)
    b1_ref,      # [1, H]     fc1 bias
    wih_ref,     # [L, H, 4H] LSTM input weights (transposed), gates i,f,g,o
    whh_ref,     # [L, H, 4H] LSTM recurrent weights (transposed)
    bl_ref,      # [L, 1, 4H] b_ih + b_hh
    w2_ref,      # [H, A]     fc2 weight (transposed)
    b2_ref,      # [1, A]     fc2 bias
    logits_ref,  # out: [B, A]
    h_out_ref,   # out: [L, B, H]
    c_out_ref,   # out: [L, B, H]
    x_sc,        # VMEM scratch [T*B, H]: inter-layer activations (never hit HBM)
):
    n_layers, h_dim, _ = wih_ref.shape
    batch = h_out_ref.shape[1]
    t_len = s_ref.shape[0] // batch

    # ---- fc1 over the whole sequence: one well-shaped matmul --------------
    x_sc[...] = (
        jnp.dot(s_ref[...], w1_ref[...], preferred_element_type=jnp.float32)
        + b1_ref[...]
    )

    h = jnp.zeros((batch, h_dim), jnp.float32)
    for layer in range(n_layers):
        # Hoisted input projection for ALL timesteps of this layer:
        #   [T*B, H] @ [H, 4H] + bias  (off the serial critical path).
        xproj = (
            jnp.dot(x_sc[...], wih_ref[layer], preferred_element_type=jnp.float32)
            + bl_ref[layer]
        )                                    # [T*B, 4H]
        whh = whh_ref[layer]                 # [H, 4H]

        h = jnp.zeros((batch, h_dim), jnp.float32)
        c = jnp.zeros((batch, h_dim), jnp.float32)
        # Sequential recurrence; T is small and static -> fully unrolled with
        # static slice indices, only h @ W_hh^T on the MXU per step.
        for t in range(t_len):
            lo = t * batch
            hi = lo + batch
            gates = xproj[lo:hi, :] + jnp.dot(
                h, whh, preferred_element_type=jnp.float32
            )                                # [B, 4H]  (PyTorch order i,f,g,o)
            i_g = jax.nn.sigmoid(gates[:, 0 * h_dim:1 * h_dim])
            f_g = jax.nn.sigmoid(gates[:, 1 * h_dim:2 * h_dim])
            g_g = jnp.tanh(gates[:, 2 * h_dim:3 * h_dim])
            o_g = jax.nn.sigmoid(gates[:, 3 * h_dim:4 * h_dim])
            c = f_g * c + i_g * g_g
            h = o_g * jnp.tanh(c)
            # Hidden output becomes next layer's input; stays resident in VMEM.
            x_sc[lo:hi, :] = h

        h_out_ref[layer] = h
        c_out_ref[layer] = c

    # ---- fc2 on the last timestep of the last layer ------------------------
    logits_ref[...] = (
        jnp.dot(h, w2_ref[...], preferred_element_type=jnp.float32) + b2_ref[...]
    ).astype(logits_ref.dtype)


# ----------------------------------------------------------------------------
# Module: parameters + forward
# ----------------------------------------------------------------------------
def init_recurrent_params(key, layer_num, state_shape, action_shape, hidden):
    """Deterministic init matching the PyTorch module's parameter shapes."""
    state_dim = int(np.prod(state_shape))
    action_dim = int(np.prod(action_shape))

    def uni(k, shape, fan_in):
        bound = 1.0 / np.sqrt(fan_in)
        return jax.random.uniform(k, shape, jnp.float32, -bound, bound)

    keys = jax.random.split(key, 4 + 4 * layer_num)
    params = {
        "fc1_w": uni(keys[0], (hidden, state_dim), state_dim),   # [H, Din]
        "fc1_b": uni(keys[1], (hidden,), state_dim),
        "fc2_w": uni(keys[2], (action_dim, hidden), hidden),     # [A, H]
        "fc2_b": uni(keys[3], (action_dim,), hidden),
        "lstm": [],
    }
    for l in range(layer_num):
        k0, k1, k2, k3 = keys[4 + 4 * l: 8 + 4 * l]
        params["lstm"].append({
            "w_ih": uni(k0, (4 * hidden, hidden), hidden),       # PyTorch layout
            "w_hh": uni(k1, (4 * hidden, hidden), hidden),
            "b_ih": uni(k2, (4 * hidden,), hidden),
            "b_hh": uni(k3, (4 * hidden,), hidden),
        })
    return params


@functools.partial(jax.jit, static_argnames=("hidden",))
def recurrent_forward(params, s, hidden):
    """s: [B, T, state_dim] (or [B, state_dim] -> unsqueezed).  state=None path.

    Returns (logits [B, action_dim], {'h': [B, L, H], 'c': [B, L, H]}).
    """
    if s.ndim == 2:
        s = s[:, None, :]
    b, t, d = s.shape
    n_layers = len(params["lstm"])
    a_dim = params["fc2_w"].shape[0]

    # Tiny layout plumbing on the raw input only: [B, T, D] -> time-major rows.
    s_tm = jnp.transpose(s, (1, 0, 2)).reshape(t * b, d).astype(jnp.float32)

    # Parameter prep (compiled once under jit).
    w1_t = params["fc1_w"].T                                     # [D, H]
    b1 = params["fc1_b"].reshape(1, hidden)
    wih_t = jnp.stack([lp["w_ih"].T for lp in params["lstm"]])   # [L, H, 4H]
    whh_t = jnp.stack([lp["w_hh"].T for lp in params["lstm"]])   # [L, H, 4H]
    bl = jnp.stack([(lp["b_ih"] + lp["b_hh"]).reshape(1, 4 * hidden)
                    for lp in params["lstm"]])                   # [L, 1, 4H]
    w2_t = params["fc2_w"].T                                     # [H, A]
    b2 = params["fc2_b"].reshape(1, a_dim)

    logits, h_lbh, c_lbh = pl.pallas_call(
        _recurrent_kernel,
        out_shape=(
            jax.ShapeDtypeStruct((b, a_dim), jnp.float32),
            jax.ShapeDtypeStruct((n_layers, b, hidden), jnp.float32),
            jax.ShapeDtypeStruct((n_layers, b, hidden), jnp.float32),
        ),
        scratch_shapes=[pltpu.VMEM((t * b, hidden), jnp.float32)],
    )(s_tm, w1_t, b1, wih_t, whh_t, bl, w2_t, b2)

    # PyTorch returns h.transpose(0, 1) -> [B, num_layers, H]
    state = {"h": jnp.transpose(h_lbh, (1, 0, 2)),
             "c": jnp.transpose(c_lbh, (1, 0, 2))}
    return logits, state


# ----------------------------------------------------------------------------
# Pure-JAX reference (for correctness check)
# ----------------------------------------------------------------------------
def recurrent_forward_ref(params, s, hidden):
    if s.ndim == 2:
        s = s[:, None, :]
    b, t, d = s.shape
    x = s @ params["fc1_w"].T + params["fc1_b"]                  # [B, T, H]
    hs, cs = [], []
    for lp in params["lstm"]:
        h = jnp.zeros((b, hidden), jnp.float32)
        c = jnp.zeros((b, hidden), jnp.float32)
        outs = []
        for step in range(t):
            gates = x[:, step] @ lp["w_ih"].T + lp["b_ih"] + h @ lp["w_hh"].T + lp["b_hh"]
            i_g = jax.nn.sigmoid(gates[:, 0 * hidden:1 * hidden])
            f_g = jax.nn.sigmoid(gates[:, 1 * hidden:2 * hidden])
            g_g = jnp.tanh(gates[:, 2 * hidden:3 * hidden])
            o_g = jax.nn.sigmoid(gates[:, 3 * hidden:4 * hidden])
            c = f_g * c + i_g * g_g
            h = o_g * jnp.tanh(c)
            outs.append(h)
        x = jnp.stack(outs, axis=1)
        hs.append(h)
        cs.append(c)
    logits = x[:, -1] @ params["fc2_w"].T + params["fc2_b"]
    return logits, {"h": jnp.stack(hs, axis=1), "c": jnp.stack(cs, axis=1)}


# ----------------------------------------------------------------------------
# Main
# ----------------------------------------------------------------------------
if __name__ == "__main__":
    LAYER_NUM = 2
    STATE_SHAPE = (8,)
    ACTION_SHAPE = (4,)
    HIDDEN = 32
    BATCH, SEQ = 2, 8

    key = jax.random.PRNGKey(0)
    pkey, skey = jax.random.split(key)
    params = init_recurrent_params(pkey, LAYER_NUM, STATE_SHAPE, ACTION_SHAPE, HIDDEN)
    s = jax.random.normal(skey, (BATCH, SEQ, int(np.prod(STATE_SHAPE))), jnp.float32)

    logits, state = recurrent_forward(params, s, HIDDEN)
    jax.block_until_ready((logits, state))

    ref_logits, ref_state = recurrent_forward_ref(params, s, HIDDEN)
    np.testing.assert_allclose(np.asarray(logits), np.asarray(ref_logits),
                               rtol=1e-4, atol=1e-4)
    np.testing.assert_allclose(np.asarray(state["h"]), np.asarray(ref_state["h"]),
                               rtol=1e-4, atol=1e-4)
    np.testing.assert_allclose(np.asarray(state["c"]), np.asarray(ref_state["c"]),
                               rtol=1e-4, atol=1e-4)

    assert logits.shape == (BATCH, int(np.prod(ACTION_SHAPE)))
    assert state["h"].shape == (BATCH, LAYER_NUM, HIDDEN)
    assert state["c"].shape == (BATCH, LAYER_NUM, HIDDEN)

    # Also exercise the 2-D (evaluation-mode) input path: [B, dim].
    logits2, state2 = recurrent_forward(params, s[:, 0, :], HIDDEN)
    ref_logits2, ref_state2 = recurrent_forward_ref(params, s[:, 0, :], HIDDEN)
    np.testing.assert_allclose(np.asarray(logits2), np.asarray(ref_logits2),
                               rtol=1e-4, atol=1e-4)
    np.testing.assert_allclose(np.asarray(state2["h"]), np.asarray(ref_state2["h"]),
                               rtol=1e-4, atol=1e-4)

    print("KERNEL_OK")
</pallas_src>

<mosaic_0001>
module attributes {stable_mosaic.version = 11 : i64} {
  func.func @_recurrent_kernel(%arg0: memref<16x8xf32, #tpu.memory_space<vmem>>, %arg1: memref<8x32xf32, #tpu.memory_space<vmem>>, %arg2: memref<1x32xf32, #tpu.memory_space<vmem>>, %arg3: memref<2x32x128xf32, #tpu.memory_space<vmem>>, %arg4: memref<2x32x128xf32, #tpu.memory_space<vmem>>, %arg5: memref<2x1x128xf32, #tpu.memory_space<vmem>>, %arg6: memref<32x4xf32, #tpu.memory_space<vmem>>, %arg7: memref<1x4xf32, #tpu.memory_space<vmem>>, %arg8: memref<2x4xf32, #tpu.memory_space<vmem>>, %arg9: memref<2x2x32xf32, #tpu.memory_space<vmem>>, %arg10: memref<2x2x32xf32, #tpu.memory_space<vmem>>, %arg11: memref<16x32xf32, #tpu.memory_space<vmem>>) attributes {dimension_semantics = [], scalar_prefetch = 0 : i64, scratch_operands = 1 : i64, tpu.core_type = #tpu.core_type<tc>} {
    %c0 = arith.constant 0 : index
    %c0_0 = arith.constant 0 : index
    %0 = vector.load %arg0[%c0, %c0_0] : memref<16x8xf32, #tpu.memory_space<vmem>>, vector<16x8xf32>
    %c0_1 = arith.constant 0 : index
    %c0_2 = arith.constant 0 : index
    %1 = vector.load %arg1[%c0_1, %c0_2] : memref<8x32xf32, #tpu.memory_space<vmem>>, vector<8x32xf32>
    %cst = arith.constant dense<0.000000e+00> : vector<16x32xf32>
    %2 = tpu.matmul %0, %1, %cst {dimension_numbers = #tpu.dot_dimension_numbers<[1], [0], [0], [1], [0, 0, 1, 1], [], []>} : vector<16x8xf32>, vector<8x32xf32>, vector<16x32xf32> -> vector<16x32xf32>
    %c0_3 = arith.constant 0 : index
    %c0_4 = arith.constant 0 : index
    %3 = vector.load %arg2[%c0_3, %c0_4] : memref<1x32xf32, #tpu.memory_space<vmem>>, vector<1x32xf32>
    %4 = vector.broadcast %3 : vector<1x32xf32> to vector<16x32xf32>
    %5 = arith.addf %2, %4 : vector<16x32xf32>
    %c0_5 = arith.constant 0 : index
    %c0_6 = arith.constant 0 : index
    %6 = vector.load %arg11[%c0_5, %c0_6] : memref<16x32xf32, #tpu.memory_space<vmem>>, vector<16x32xf32>
    tpu.vector_store %arg11[%c0_5, %c0_6], %5 {strides = array<i32>} : memref<16x32xf32, #tpu.memory_space<vmem>>, vector<16x32xf32>,
    %c0_7 = arith.constant 0 : index
    %c0_8 = arith.constant 0 : index
    %7 = vector.load %arg11[%c0_7, %c0_8] : memref<16x32xf32, #tpu.memory_space<vmem>>, vector<16x32xf32>
    %c0_9 = arith.constant 0 : index
    %c0_10 = arith.constant 0 : index
    %c0_11 = arith.constant 0 : index
    %8 = vector.load %arg3[%c0_9, %c0_10, %c0_11] : memref<2x32x128xf32, #tpu.memory_space<vmem>>, vector<1x32x128xf32>
    %9 = vector.shape_cast %8 : vector<1x32x128xf32> to vector<32x128xf32>
    %cst_12 = arith.constant dense<0.000000e+00> : vector<16x128xf32>
    %10 = tpu.matmul %7, %9, %cst_12 {dimension_numbers = #tpu.dot_dimension_numbers<[1], [0], [0], [1], [0, 0, 1, 1], [], []>} : vector<16x32xf32>, vector<32x128xf32>, vector<16x128xf32> -> vector<16x128xf32>
    %c0_13 = arith.constant 0 : index
    %c0_14 = arith.constant 0 : index
    %c0_15 = arith.constant 0 : index
    %11 = vector.load %arg5[%c0_13, %c0_14, %c0_15] : memref<2x1x128xf32, #tpu.memory_space<vmem>>, vector<1x1x128xf32>
    %12 = vector.shape_cast %11 : vector<1x1x128xf32> to vector<1x128xf32>
    %13 = vector.broadcast %12 : vector<1x128xf32> to vector<16x128xf32>
    %14 = arith.addf %10, %13 : vector<16x128xf32>
    %c0_16 = arith.constant 0 : index
    %c0_17 = arith.constant 0 : index
    %c0_18 = arith.constant 0 : index
    %15 = vector.load %arg4[%c0_16, %c0_17, %c0_18] : memref<2x32x128xf32, #tpu.memory_space<vmem>>, vector<1x32x128xf32>
    %16 = vector.shape_cast %15 : vector<1x32x128xf32> to vector<32x128xf32>
    %cst_19 = arith.constant 0.000000e+00 : f32
    %17 = vector.broadcast %cst_19 : f32 to vector<2x32xf32>
    %cst_20 = arith.constant 0.000000e+00 : f32
    %18 = vector.broadcast %cst_20 : f32 to vector<2x32xf32>
    %19 = vector.extract_strided_slice %14 {offsets = [0, 0], sizes = [2, 128], strides = [1, 1]} : vector<16x128xf32> to vector<2x128xf32>
    %cst_21 = arith.constant dense<0.000000e+00> : vector<2x128xf32>
    %20 = tpu.matmul %17, %16, %cst_21 {dimension_numbers = #tpu.dot_dimension_numbers<[1], [0], [0], [1], [0, 0, 1, 1], [], []>} : vector<2x32xf32>, vector<32x128xf32>, vector<2x128xf32> -> vector<2x128xf32>
    %21 = arith.addf %19, %20 : vector<2x128xf32>
    %22 = vector.extract_strided_slice %21 {offsets = [0, 0], sizes = [2, 32], strides = [1, 1]} : vector<2x128xf32> to vector<2x32xf32>
    %23 = arith.negf %22 : vector<2x32xf32>
    %24 = math.exp %23 : vector<2x32xf32>
    %cst_22 = arith.constant 1.000000e+00 : f32
    %25 = vector.broadcast %cst_22 : f32 to vector<2x32xf32>
    %26 = arith.addf %25, %24 : vector<2x32xf32>
    %27 = arith.divf %25, %26 : vector<2x32xf32>
    %28 = vector.extract_strided_slice %21 {offsets = [0, 32], sizes = [2, 32], strides = [1, 1]} : vector<2x128xf32> to vector<2x32xf32>
    %29 = arith.negf %28 : vector<2x32xf32>
    %30 = math.exp %29 : vector<2x32xf32>
    %cst_23 = arith.constant 1.000000e+00 : f32
    %31 = vector.broadcast %cst_23 : f32 to vector<2x32xf32>
    %32 = arith.addf %31, %30 : vector<2x32xf32>
    %33 = arith.divf %31, %32 : vector<2x32xf32>
    %34 = vector.extract_strided_slice %21 {offsets = [0, 64], sizes = [2, 32], strides = [1, 1]} : vector<2x128xf32> to vector<2x32xf32>
    %35 = math.tanh %34 : vector<2x32xf32>
    %36 = vector.extract_strided_slice %21 {offsets = [0, 96], sizes = [2, 32], strides = [1, 1]} : vector<2x128xf32> to vector<2x32xf32>
    %37 = arith.negf %36 : vector<2x32xf32>
    %38 = math.exp %37 : vector<2x32xf32>
    %cst_24 = arith.constant 1.000000e+00 : f32
    %39 = vector.broadcast %cst_24 : f32 to vector<2x32xf32>
    %40 = arith.addf %39, %38 : vector<2x32xf32>
    %41 = arith.divf %39, %40 : vector<2x32xf32>
    %42 = arith.mulf %33, %18 : vector<2x32xf32>
    %43 = arith.mulf %27, %35 : vector<2x32xf32>
    %44 = arith.addf %42, %43 : vector<2x32xf32>
    %45 = math.tanh %44 : vector<2x32xf32>
    %46 = arith.mulf %41, %45 : vector<2x32xf32>
    %c0_25 = arith.constant 0 : index
    %c0_26 = arith.constant 0 : index
    %47 = vector.load %arg11[%c0_25, %c0_26] : memref<16x32xf32, #tpu.memory_space<vmem>>, vector<2x32xf32>
    tpu.vector_store %arg11[%c0_25, %c0_26], %46 {strides = array<i32>} : memref<16x32xf32, #tpu.memory_space<vmem>>, vector<2x32xf32>,
    %48 = vector.extract_strided_slice %14 {offsets = [2, 0], sizes = [2, 128], strides = [1, 1]} : vector<16x128xf32> to vector<2x128xf32>
    %cst_27 = arith.constant dense<0.000000e+00> : vector<2x128xf32>
    %49 = tpu.matmul %46, %16, %cst_27 {dimension_numbers = #tpu.dot_dimension_numbers<[1], [0], [0], [1], [0, 0, 1, 1], [], []>} : vector<2x32xf32>, vector<32x128xf32>, vector<2x128xf32> -> vector<2x128xf32>
    %50 = arith.addf %48, %49 : vector<2x128xf32>
    %51 = vector.extract_strided_slice %50 {offsets = [0, 0], sizes = [2, 32], strides = [1, 1]} : vector<2x128xf32> to vector<2x32xf32>
    %52 = arith.negf %51 : vector<2x32xf32>
    %53 = math.exp %52 : vector<2x32xf32>
    %cst_28 = arith.constant 1.000000e+00 : f32
    %54 = vector.broadcast %cst_28 : f32 to vector<2x32xf32>
    %55 = arith.addf %54, %53 : vector<2x32xf32>
    %56 = arith.divf %54, %55 : vector<2x32xf32>
    %57 = vector.extract_strided_slice %50 {offsets = [0, 32], sizes = [2, 32], strides = [1, 1]} : vector<2x128xf32> to vector<2x32xf32>
    %58 = arith.negf %57 : vector<2x32xf32>
    %59 = math.exp %58 : vector<2x32xf32>
    %cst_29 = arith.constant 1.000000e+00 : f32
    %60 = vector.broadcast %cst_29 : f32 to vector<2x32xf32>
    %61 = arith.addf %60, %59 : vector<2x32xf32>
    %62 = arith.divf %60, %61 : vector<2x32xf32>
    %63 = vector.extract_strided_slice %50 {offsets = [0, 64], sizes = [2, 32], strides = [1, 1]} : vector<2x128xf32> to vector<2x32xf32>
    %64 = math.tanh %63 : vector<2x32xf32>
    %65 = vector.extract_strided_slice %50 {offsets = [0, 96], sizes = [2, 32], strides = [1, 1]} : vector<2x128xf32> to vector<2x32xf32>
    %66 = arith.negf %65 : vector<2x32xf32>
    %67 = math.exp %66 : vector<2x32xf32>
    %cst_30 = arith.constant 1.000000e+00 : f32
    %68 = vector.broadcast %cst_30 : f32 to vector<2x32xf32>
    %69 = arith.addf %68, %67 : vector<2x32xf32>
    %70 = arith.divf %68, %69 : vector<2x32xf32>
    %71 = arith.mulf %62, %44 : vector<2x32xf32>
    %72 = arith.mulf %56, %64 : vector<2x32xf32>
    %73 = arith.addf %71, %72 : vector<2x32xf32>
    %74 = math.tanh %73 : vector<2x32xf32>
    %75 = arith.mulf %70, %74 : vector<2x32xf32>
    %c2 = arith.constant 2 : index
    %c0_31 = arith.constant 0 : index
    %76 = vector.load %arg11[%c2, %c0_31] : memref<16x32xf32, #tpu.memory_space<vmem>>, vector<2x32xf32>
    tpu.vector_store %arg11[%c2, %c0_31], %75 {strides = array<i32>} : memref<16x32xf32, #tpu.memory_space<vmem>>, vector<2x32xf32>,
    %77 = vector.extract_strided_slice %14 {offsets = [4, 0], sizes = [2, 128], strides = [1, 1]} : vector<16x128xf32> to vector<2x128xf32>
    %cst_32 = arith.constant dense<0.000000e+00> : vector<2x128xf32>
    %78 = tpu.matmul %75, %16, %cst_32 {dimension_numbers = #tpu.dot_dimension_numbers<[1], [0], [0], [1], [0, 0, 1, 1], [], []>} : vector<2x32xf32>, vector<32x128xf32>, vector<2x128xf32> -> vector<2x128xf32>
    %79 = arith.addf %77, %78 : vector<2x128xf32>
    %80 = vector.extract_strided_slice %79 {offsets = [0, 0], sizes = [2, 32], strides = [1, 1]} : vector<2x128xf32> to vector<2x32xf32>
    %81 = arith.negf %80 : vector<2x32xf32>
    %82 = math.exp %81 : vector<2x32xf32>
    %cst_33 = arith.constant 1.000000e+00 : f32
    %83 = vector.broadcast %cst_33 : f32 to vector<2x32xf32>
    %84 = arith.addf %83, %82 : vector<2x32xf32>
    %85 = arith.divf %83, %84 : vector<2x32xf32>
    %86 = vector.extract_strided_slice %79 {offsets = [0, 32], sizes = [2, 32], strides = [1, 1]} : vector<2x128xf32> to vector<2x32xf32>
    %87 = arith.negf %86 : vector<2x32xf32>
    %88 = math.exp %87 : vector<2x32xf32>
    %cst_34 = arith.constant 1.000000e+00 : f32
    %89 = vector.broadcast %cst_34 : f32 to vector<2x32xf32>
    %90 = arith.addf %89, %88 : vector<2x32xf32>
    %91 = arith.divf %89, %90 : vector<2x32xf32>
    %92 = vector.extract_strided_slice %79 {offsets = [0, 64], sizes = [2, 32], strides = [1, 1]} : vector<2x128xf32> to vector<2x32xf32>
    %93 = math.tanh %92 : vector<2x32xf32>
    %94 = vector.extract_strided_slice %79 {offsets = [0, 96], sizes = [2, 32], strides = [1, 1]} : vector<2x128xf32> to vector<2x32xf32>
    %95 = arith.negf %94 : vector<2x32xf32>
    %96 = math.exp %95 : vector<2x32xf32>
    %cst_35 = arith.constant 1.000000e+00 : f32
    %97 = vector.broadcast %cst_35 : f32 to vector<2x32xf32>
    %98 = arith.addf %97, %96 : vector<2x32xf32>
    %99 = arith.divf %97, %98 : vector<2x32xf32>
    %100 = arith.mulf %91, %73 : vector<2x32xf32>
    %101 = arith.mulf %85, %93 : vector<2x32xf32>
    %102 = arith.addf %100, %101 : vector<2x32xf32>
    %103 = math.tanh %102 : vector<2x32xf32>
    %104 = arith.mulf %99, %103 : vector<2x32xf32>
    %c4 = arith.constant 4 : index
    %c0_36 = arith.constant 0 : index
    %105 = vector.load %arg11[%c4, %c0_36] : memref<16x32xf32, #tpu.memory_space<vmem>>, vector<2x32xf32>
    tpu.vector_store %arg11[%c4, %c0_36], %104 {strides = array<i32>} : memref<16x32xf32, #tpu.memory_space<vmem>>, vector<2x32xf32>,
    %106 = vector.extract_strided_slice %14 {offsets = [6, 0], sizes = [2, 128], strides = [1, 1]} : vector<16x128xf32> to vector<2x128xf32>
    %cst_37 = arith.constant dense<0.000000e+00> : vector<2x128xf32>
    %107 = tpu.matmul %104, %16, %cst_37 {dimension_numbers = #tpu.dot_dimension_numbers<[1], [0], [0], [1], [0, 0, 1, 1], [], []>} : vector<2x32xf32>, vector<32x128xf32>, vector<2x128xf32> -> vector<2x128xf32>
    %108 = arith.addf %106, %107 : vector<2x128xf32>
    %109 = vector.extract_strided_slice %108 {offsets = [0, 0], sizes = [2, 32], strides = [1, 1]} : vector<2x128xf32> to vector<2x32xf32>
    %110 = arith.negf %109 : vector<2x32xf32>
    %111 = math.exp %110 : vector<2x32xf32>
    %cst_38 = arith.constant 1.000000e+00 : f32
    %112 = vector.broadcast %cst_38 : f32 to vector<2x32xf32>
    %113 = arith.addf %112, %111 : vector<2x32xf32>
    %114 = arith.divf %112, %113 : vector<2x32xf32>
    %115 = vector.extract_strided_slice %108 {offsets = [0, 32], sizes = [2, 32], strides = [1, 1]} : vector<2x128xf32> to vector<2x32xf32>
    %116 = arith.negf %115 : vector<2x32xf32>
    %117 = math.exp %116 : vector<2x32xf32>
    %cst_39 = arith.constant 1.000000e+00 : f32
    %118 = vector.broadcast %cst_39 : f32 to vector<2x32xf32>
    %119 = arith.addf %118, %117 : vector<2x32xf32>
    %120 = arith.divf %118, %119 : vector<2x32xf32>
    %121 = vector.extract_strided_slice %108 {offsets = [0, 64], sizes = [2, 32], strides = [1, 1]} : vector<2x128xf32> to vector<2x32xf32>
    %122 = math.tanh %121 : vector<2x32xf32>
    %123 = vector.extract_strided_slice %108 {offsets = [0, 96], sizes = [2, 32], strides = [1, 1]} : vector<2x128xf32> to vector<2x32xf32>
    %124 = arith.negf %123 : vector<2x32xf32>
    %125 = math.exp %124 : vector<2x32xf32>
    %cst_40 = arith.constant 1.000000e+00 : f32
    %126 = vector.broadcast %cst_40 : f32 to vector<2x32xf32>
    %127 = arith.addf %126, %125 : vector<2x32xf32>
    %128 = arith.divf %126, %127 : vector<2x32xf32>
    %129 = arith.mulf %120, %102 : vector<2x32xf32>
    %130 = arith.mulf %114, %122 : vector<2x32xf32>
    %131 = arith.addf %129, %130 : vector<2x32xf32>
    %132 = math.tanh %131 : vector<2x32xf32>
    %133 = arith.mulf %128, %132 : vector<2x32xf32>
    %c6 = arith.constant 6 : index
    %c0_41 = arith.constant 0 : index
    %134 = vector.load %arg11[%c6, %c0_41] : memref<16x32xf32, #tpu.memory_space<vmem>>, vector<2x32xf32>
    tpu.vector_store %arg11[%c6, %c0_41], %133 {strides = array<i32>} : memref<16x32xf32, #tpu.memory_space<vmem>>, vector<2x32xf32>,
    %135 = vector.extract_strided_slice %14 {offsets = [8, 0], sizes = [2, 128], strides = [1, 1]} : vector<16x128xf32> to vector<2x128xf32>
    %cst_42 = arith.constant dense<0.000000e+00> : vector<2x128xf32>
    %136 = tpu.matmul %133, %16, %cst_42 {dimension_numbers = #tpu.dot_dimension_numbers<[1], [0], [0], [1], [0, 0, 1, 1], [], []>} : vector<2x32xf32>, vector<32x128xf32>, vector<2x128xf32> -> vector<2x128xf32>
    %137 = arith.addf %135, %136 : vector<2x128xf32>
    %138 = vector.extract_strided_slice %137 {offsets = [0, 0], sizes = [2, 32], strides = [1, 1]} : vector<2x128xf32> to vector<2x32xf32>
    %139 = arith.negf %138 : vector<2x32xf32>
    %140 = math.exp %139 : vector<2x32xf32>
    %cst_43 = arith.constant 1.000000e+00 : f32
    %141 = vector.broadcast %cst_43 : f32 to vector<2x32xf32>
    %142 = arith.addf %141, %140 : vector<2x32xf32>
    %143 = arith.divf %141, %142 : vector<2x32xf32>
    %144 = vector.extract_strided_slice %137 {offsets = [0, 32], sizes = [2, 32], strides = [1, 1]} : vector<2x128xf32> to vector<2x32xf32>
    %145 = arith.negf %144 : vector<2x32xf32>
    %146 = math.exp %145 : vector<2x32xf32>
    %cst_44 = arith.constant 1.000000e+00 : f32
    %147 = vector.broadcast %cst_44 : f32 to vector<2x32xf32>
    %148 = arith.addf %147, %146 : vector<2x32xf32>
    %149 = arith.divf %147, %148 : vector<2x32xf32>
    %150 = vector.extract_strided_slice %137 {offsets = [0, 64], sizes = [2, 32], strides = [1, 1]} : vector<2x128xf32> to vector<2x32xf32>
    %151 = math.tanh %150 : vector<2x32xf32>
    %152 = vector.extract_strided_slice %137 {offsets = [0, 96], sizes = [2, 32], strides = [1, 1]} : vector<2x128xf32> to vector<2x32xf32>
    %153 = arith.negf %152 : vector<2x32xf32>
    %154 = math.exp %153 : vector<2x32xf32>
    %cst_45 = arith.constant 1.000000e+00 : f32
    %155 = vector.broadcast %cst_45 : f32 to vector<2x32xf32>
    %156 = arith.addf %155, %154 : vector<2x32xf32>
    %157 = arith.divf %155, %156 : vector<2x32xf32>
    %158 = arith.mulf %149, %131 : vector<2x32xf32>
    %159 = arith.mulf %143, %151 : vector<2x32xf32>
    %160 = arith.addf %158, %159 : vector<2x32xf32>
    %161 = math.tanh %160 : vector<2x32xf32>
    %162 = arith.mulf %157, %161 : vector<2x32xf32>
    %c8 = arith.constant 8 : index
    %c0_46 = arith.constant 0 : index
    %163 = vector.load %arg11[%c8, %c0_46] : memref<16x32xf32, #tpu.memory_space<vmem>>, vector<2x32xf32>
    tpu.vector_store %arg11[%c8, %c0_46], %162 {strides = array<i32>} : memref<16x32xf32, #tpu.memory_space<vmem>>, vector<2x32xf32>,
    %164 = vector.extract_strided_slice %14 {offsets = [10, 0], sizes = [2, 128], strides = [1, 1]} : vector<16x128xf32> to vector<2x128xf32>
    %cst_47 = arith.constant dense<0.000000e+00> : vector<2x128xf32>
    %165 = tpu.matmul %162, %16, %cst_47 {dimension_numbers = #tpu.dot_dimension_numbers<[1], [0], [0], [1], [0, 0, 1, 1], [], []>} : vector<2x32xf32>, vector<32x128xf32>, vector<2x128xf32> -> vector<2x128xf32>
    %166 = arith.addf %164, %165 : vector<2x128xf32>
    %167 = vector.extract_strided_slice %166 {offsets = [0, 0], sizes = [2, 32], strides = [1, 1]} : vector<2x128xf32> to vector<2x32xf32>
    %168 = arith.negf %167 : vector<2x32xf32>
    %169 = math.exp %168 : vector<2x32xf32>
    %cst_48 = arith.constant 1.000000e+00 : f32
    %170 = vector.broadcast %cst_48 : f32 to vector<2x32xf32>
    %171 = arith.addf %170, %169 : vector<2x32xf32>
    %172 = arith.divf %170, %171 : vector<2x32xf32>
    %173 = vector.extract_strided_slice %166 {offsets = [0, 32], sizes = [2, 32], strides = [1, 1]} : vector<2x128xf32> to vector<2x32xf32>
    %174 = arith.negf %173 : vector<2x32xf32>
    %175 = math.exp %174 : vector<2x32xf32>
    %cst_49 = arith.constant 1.000000e+00 : f32
    %176 = vector.broadcast %cst_49 : f32 to vector<2x32xf32>
    %177 = arith.addf %176, %175 : vector<2x32xf32>
    %178 = arith.divf %176, %177 : vector<2x32xf32>
    %179 = vector.extract_strided_slice %166 {offsets = [0, 64], sizes = [2, 32], strides = [1, 1]} : vector<2x128xf32> to vector<2x32xf32>
    %180 = math.tanh %179 : vector<2x32xf32>
    %181 = vector.extract_strided_slice %166 {offsets = [0, 96], sizes = [2, 32], strides = [1, 1]} : vector<2x128xf32> to vector<2x32xf32>
    %182 = arith.negf %181 : vector<2x32xf32>
    %183 = math.exp %182 : vector<2x32xf32>
    %cst_50 = arith.constant 1.000000e+00 : f32
    %184 = vector.broadcast %cst_50 : f32 to vector<2x32xf32>
    %185 = arith.addf %184, %183 : vector<2x32xf32>
    %186 = arith.divf %184, %185 : vector<2x32xf32>
    %187 = arith.mulf %178, %160 : vector<2x32xf32>
    %188 = arith.mulf %172, %180 : vector<2x32xf32>
    %189 = arith.addf %187, %188 : vector<2x32xf32>
    %190 = math.tanh %189 : vector<2x32xf32>
    %191 = arith.mulf %186, %190 : vector<2x32xf32>
    %c10 = arith.constant 10 : index
    %c0_51 = arith.constant 0 : index
    %192 = vector.load %arg11[%c10, %c0_51] : memref<16x32xf32, #tpu.memory_space<vmem>>, vector<2x32xf32>
    tpu.vector_store %arg11[%c10, %c0_51], %191 {strides = array<i32>} : memref<16x32xf32, #tpu.memory_space<vmem>>, vector<2x32xf32>,
    %193 = vector.extract_strided_slice %14 {offsets = [12, 0], sizes = [2, 128], strides = [1, 1]} : vector<16x128xf32> to vector<2x128xf32>
    %cst_52 = arith.constant dense<0.000000e+00> : vector<2x128xf32>
    %194 = tpu.matmul %191, %16, %cst_52 {dimension_numbers = #tpu.dot_dimension_numbers<[1], [0], [0], [1], [0, 0, 1, 1], [], []>} : vector<2x32xf32>, vector<32x128xf32>, vector<2x128xf32> -> vector<2x128xf32>
    %195 = arith.addf %193, %194 : vector<2x128xf32>
    %196 = vector.extract_strided_slice %195 {offsets = [0, 0], sizes = [2, 32], strides = [1, 1]} : vector<2x128xf32> to vector<2x32xf32>
    %197 = arith.negf %196 : vector<2x32xf32>
    %198 = math.exp %197 : vector<2x32xf32>
    %cst_53 = arith.constant 1.000000e+00 : f32
    %199 = vector.broadcast %cst_53 : f32 to vector<2x32xf32>
    %200 = arith.addf %199, %198 : vector<2x32xf32>
    %201 = arith.divf %199, %200 : vector<2x32xf32>
    %202 = vector.extract_strided_slice %195 {offsets = [0, 32], sizes = [2, 32], strides = [1, 1]} : vector<2x128xf32> to vector<2x32xf32>
    %203 = arith.negf %202 : vector<2x32xf32>
    %204 = math.exp %203 : vector<2x32xf32>
    %cst_54 = arith.constant 1.000000e+00 : f32
    %205 = vector.broadcast %cst_54 : f32 to vector<2x32xf32>
    %206 = arith.addf %205, %204 : vector<2x32xf32>
    %207 = arith.divf %205, %206 : vector<2x32xf32>
    %208 = vector.extract_strided_slice %195 {offsets = [0, 64], sizes = [2, 32], strides = [1, 1]} : vector<2x128xf32> to vector<2x32xf32>
    %209 = math.tanh %208 : vector<2x32xf32>
    %210 = vector.extract_strided_slice %195 {offsets = [0, 96], sizes = [2, 32], strides = [1, 1]} : vector<2x128xf32> to vector<2x32xf32>
    %211 = arith.negf %210 : vector<2x32xf32>
    %212 = math.exp %211 : vector<2x32xf32>
    %cst_55 = arith.constant 1.000000e+00 : f32
    %213 = vector.broadcast %cst_55 : f32 to vector<2x32xf32>
    %214 = arith.addf %213, %212 : vector<2x32xf32>
    %215 = arith.divf %213, %214 : vector<2x32xf32>
    %216 = arith.mulf %207, %189 : vector<2x32xf32>
    %217 = arith.mulf %201, %209 : vector<2x32xf32>
    %218 = arith.addf %216, %217 : vector<2x32xf32>
    %219 = math.tanh %218 : vector<2x32xf32>
    %220 = arith.mulf %215, %219 : vector<2x32xf32>
    %c12 = arith.constant 12 : index
    %c0_56 = arith.constant 0 : index
    %221 = vector.load %arg11[%c12, %c0_56] : memref<16x32xf32, #tpu.memory_space<vmem>>, vector<2x32xf32>
    tpu.vector_store %arg11[%c12, %c0_56], %220 {strides = array<i32>} : memref<16x32xf32, #tpu.memory_space<vmem>>, vector<2x32xf32>,
    %222 = vector.extract_strided_slice %14 {offsets = [14, 0], sizes = [2, 128], strides = [1, 1]} : vector<16x128xf32> to vector<2x128xf32>
    %cst_57 = arith.constant dense<0.000000e+00> : vector<2x128xf32>
    %223 = tpu.matmul %220, %16, %cst_57 {dimension_numbers = #tpu.dot_dimension_numbers<[1], [0], [0], [1], [0, 0, 1, 1], [], []>} : vector<2x32xf32>, vector<32x128xf32>, vector<2x128xf32> -> vector<2x128xf32>
    %224 = arith.addf %222, %223 : vector<2x128xf32>
    %225 = vector.extract_strided_slice %224 {offsets = [0, 0], sizes = [2, 32], strides = [1, 1]} : vector<2x128xf32> to vector<2x32xf32>
    %226 = arith.negf %225 : vector<2x32xf32>
    %227 = math.exp %226 : vector<2x32xf32>
    %cst_58 = arith.constant 1.000000e+00 : f32
    %228 = vector.broadcast %cst_58 : f32 to vector<2x32xf32>
    %229 = arith.addf %228, %227 : vector<2x32xf32>
    %230 = arith.divf %228, %229 : vector<2x32xf32>
    %231 = vector.extract_strided_slice %224 {offsets = [0, 32], sizes = [2, 32], strides = [1, 1]} : vector<2x128xf32> to vector<2x32xf32>
    %232 = arith.negf %231 : vector<2x32xf32>
    %233 = math.exp %232 : vector<2x32xf32>
    %cst_59 = arith.constant 1.000000e+00 : f32
    %234 = vector.broadcast %cst_59 : f32 to vector<2x32xf32>
    %235 = arith.addf %234, %233 : vector<2x32xf32>
    %236 = arith.divf %234, %235 : vector<2x32xf32>
    %237 = vector.extract_strided_slice %224 {offsets = [0, 64], sizes = [2, 32], strides = [1, 1]} : vector<2x128xf32> to vector<2x32xf32>
    %238 = math.tanh %237 : vector<2x32xf32>
    %239 = vector.extract_strided_slice %224 {offsets = [0, 96], sizes = [2, 32], strides = [1, 1]} : vector<2x128xf32> to vector<2x32xf32>
    %240 = arith.negf %239 : vector<2x32xf32>
    %241 = math.exp %240 : vector<2x32xf32>
    %cst_60 = arith.constant 1.000000e+00 : f32
    %242 = vector.broadcast %cst_60 : f32 to vector<2x32xf32>
    %243 = arith.addf %242, %241 : vector<2x32xf32>
    %244 = arith.divf %242, %243 : vector<2x32xf32>
    %245 = arith.mulf %236, %218 : vector<2x32xf32>
    %246 = arith.mulf %230, %238 : vector<2x32xf32>
    %247 = arith.addf %245, %246 : vector<2x32xf32>
    %248 = math.tanh %247 : vector<2x32xf32>
    %249 = arith.mulf %244, %248 : vector<2x32xf32>
    %c14 = arith.constant 14 : index
    %c0_61 = arith.constant 0 : index
    %250 = vector.load %arg11[%c14, %c0_61] : memref<16x32xf32, #tpu.memory_space<vmem>>, vector<2x32xf32>
    tpu.vector_store %arg11[%c14, %c0_61], %249 {strides = array<i32>} : memref<16x32xf32, #tpu.memory_space<vmem>>, vector<2x32xf32>,
    %c0_62 = arith.constant 0 : index
    %c0_63 = arith.constant 0 : index
    %c0_64 = arith.constant 0 : index
    %251 = vector.load %arg9[%c0_62, %c0_63, %c0_64] : memref<2x2x32xf32, #tpu.memory_space<vmem>>, vector<1x2x32xf32>
    %252 = vector.shape_cast %251 : vector<1x2x32xf32> to vector<2x32xf32>
    %253 = vector.shape_cast %249 : vector<2x32xf32> to vector<1x2x32xf32>
    tpu.vector_store %arg9[%c0_62, %c0_63, %c0_64], %253 {strides = array<i32>} : memref<2x2x32xf32, #tpu.memory_space<vmem>>, vector<1x2x32xf32>,
    %c0_65 = arith.constant 0 : index
    %c0_66 = arith.constant 0 : index
    %c0_67 = arith.constant 0 : index
    %254 = vector.load %arg10[%c0_65, %c0_66, %c0_67] : memref<2x2x32xf32, #tpu.memory_space<vmem>>, vector<1x2x32xf32>
    %255 = vector.shape_cast %254 : vector<1x2x32xf32> to vector<2x32xf32>
    %256 = vector.shape_cast %247 : vector<2x32xf32> to vector<1x2x32xf32>
    tpu.vector_store %arg10[%c0_65, %c0_66, %c0_67], %256 {strides = array<i32>} : memref<2x2x32xf32, #tpu.memory_space<vmem>>, vector<1x2x32xf32>,
    %c0_68 = arith.constant 0 : index
    %c0_69 = arith.constant 0 : index
    %257 = vector.load %arg11[%c0_68, %c0_69] : memref<16x32xf32, #tpu.memory_space<vmem>>, vector<16x32xf32>
    %c1 = arith.constant 1 : index
    %c0_70 = arith.constant 0 : index
    %c0_71 = arith.constant 0 : index
    %258 = vector.load %arg3[%c1, %c0_70, %c0_71] : memref<2x32x128xf32, #tpu.memory_space<vmem>>, vector<1x32x128xf32>
    %259 = vector.shape_cast %258 : vector<1x32x128xf32> to vector<32x128xf32>
    %cst_72 = arith.constant dense<0.000000e+00> : vector<16x128xf32>
    %260 = tpu.matmul %257, %259, %cst_72 {dimension_numbers = #tpu.dot_dimension_numbers<[1], [0], [0], [1], [0, 0, 1, 1], [], []>} : vector<16x32xf32>, vector<32x128xf32>, vector<16x128xf32> -> vector<16x128xf32>
    %c1_73 = arith.constant 1 : index
    %c0_74 = arith.constant 0 : index
    %c0_75 = arith.constant 0 : index
    %261 = vector.load %arg5[%c1_73, %c0_74, %c0_75] : memref<2x1x128xf32, #tpu.memory_space<vmem>>, vector<1x1x128xf32>
    %262 = vector.shape_cast %261 : vector<1x1x128xf32> to vector<1x128xf32>
    %263 = vector.broadcast %262 : vector<1x128xf32> to vector<16x128xf32>
    %264 = arith.addf %260, %263 : vector<16x128xf32>
    %c1_76 = arith.constant 1 : index
    %c0_77 = arith.constant 0 : index
    %c0_78 = arith.constant 0 : index
    %265 = vector.load %arg4[%c1_76, %c0_77, %c0_78] : memref<2x32x128xf32, #tpu.memory_space<vmem>>, vector<1x32x128xf32>
    %266 = vector.shape_cast %265 : vector<1x32x128xf32> to vector<32x128xf32>
    %cst_79 = arith.constant 0.000000e+00 : f32
    %267 = vector.broadcast %cst_79 : f32 to vector<2x32xf32>
    %cst_80 = arith.constant 0.000000e+00 : f32
    %268 = vector.broadcast %cst_80 : f32 to vector<2x32xf32>
    %269 = vector.extract_strided_slice %264 {offsets = [0, 0], sizes = [2, 128], strides = [1, 1]} : vector<16x128xf32> to vector<2x128xf32>
    %cst_81 = arith.constant dense<0.000000e+00> : vector<2x128xf32>
    %270 = tpu.matmul %267, %266, %cst_81 {dimension_numbers = #tpu.dot_dimension_numbers<[1], [0], [0], [1], [0, 0, 1, 1], [], []>} : vector<2x32xf32>, vector<32x128xf32>, vector<2x128xf32> -> vector<2x128xf32>
    %271 = arith.addf %269, %270 : vector<2x128xf32>
    %272 = vector.extract_strided_slice %271 {offsets = [0, 0], sizes = [2, 32], strides = [1, 1]} : vector<2x128xf32> to vector<2x32xf32>
    %273 = arith.negf %272 : vector<2x32xf32>
    %274 = math.exp %273 : vector<2x32xf32>
    %cst_82 = arith.constant 1.000000e+00 : f32
    %275 = vector.broadcast %cst_82 : f32 to vector<2x32xf32>
    %276 = arith.addf %275, %274 : vector<2x32xf32>
    %277 = arith.divf %275, %276 : vector<2x32xf32>
    %278 = vector.extract_strided_slice %271 {offsets = [0, 32], sizes = [2, 32], strides = [1, 1]} : vector<2x128xf32> to vector<2x32xf32>
    %279 = arith.negf %278 : vector<2x32xf32>
    %280 = math.exp %279 : vector<2x32xf32>
    %cst_83 = arith.constant 1.000000e+00 : f32
    %281 = vector.broadcast %cst_83 : f32 to vector<2x32xf32>
    %282 = arith.addf %281, %280 : vector<2x32xf32>
    %283 = arith.divf %281, %282 : vector<2x32xf32>
    %284 = vector.extract_strided_slice %271 {offsets = [0, 64], sizes = [2, 32], strides = [1, 1]} : vector<2x128xf32> to vector<2x32xf32>
    %285 = math.tanh %284 : vector<2x32xf32>
    %286 = vector.extract_strided_slice %271 {offsets = [0, 96], sizes = [2, 32], strides = [1, 1]} : vector<2x128xf32> to vector<2x32xf32>
    %287 = arith.negf %286 : vector<2x32xf32>
    %288 = math.exp %287 : vector<2x32xf32>
    %cst_84 = arith.constant 1.000000e+00 : f32
    %289 = vector.broadcast %cst_84 : f32 to vector<2x32xf32>
    %290 = arith.addf %289, %288 : vector<2x32xf32>
    %291 = arith.divf %289, %290 : vector<2x32xf32>
    %292 = arith.mulf %283, %268 : vector<2x32xf32>
    %293 = arith.mulf %277, %285 : vector<2x32xf32>
    %294 = arith.addf %292, %293 : vector<2x32xf32>
    %295 = math.tanh %294 : vector<2x32xf32>
    %296 = arith.mulf %291, %295 : vector<2x32xf32>
    %c0_85 = arith.constant 0 : index
    %c0_86 = arith.constant 0 : index
    %297 = vector.load %arg11[%c0_85, %c0_86] : memref<16x32xf32, #tpu.memory_space<vmem>>, vector<2x32xf32>
    tpu.vector_store %arg11[%c0_85, %c0_86], %296 {strides = array<i32>} : memref<16x32xf32, #tpu.memory_space<vmem>>, vector<2x32xf32>,
    %298 = vector.extract_strided_slice %264 {offsets = [2, 0], sizes = [2, 128], strides = [1, 1]} : vector<16x128xf32> to vector<2x128xf32>
    %cst_87 = arith.constant dense<0.000000e+00> : vector<2x128xf32>
    %299 = tpu.matmul %296, %266, %cst_87 {dimension_numbers = #tpu.dot_dimension_numbers<[1], [0], [0], [1], [0, 0, 1, 1], [], []>} : vector<2x32xf32>, vector<32x128xf32>, vector<2x128xf32> -> vector<2x128xf32>
    %300 = arith.addf %298, %299 : vector<2x128xf32>
    %301 = vector.extract_strided_slice %300 {offsets = [0, 0], sizes = [2, 32], strides = [1, 1]} : vector<2x128xf32> to vector<2x32xf32>
    %302 = arith.negf %301 : vector<2x32xf32>
    %303 = math.exp %302 : vector<2x32xf32>
    %cst_88 = arith.constant 1.000000e+00 : f32
    %304 = vector.broadcast %cst_88 : f32 to vector<2x32xf32>
    %305 = arith.addf %304, %303 : vector<2x32xf32>
    %306 = arith.divf %304, %305 : vector<2x32xf32>
    %307 = vector.extract_strided_slice %300 {offsets = [0, 32], sizes = [2, 32], strides = [1, 1]} : vector<2x128xf32> to vector<2x32xf32>
    %308 = arith.negf %307 : vector<2x32xf32>
    %309 = math.exp %308 : vector<2x32xf32>
    %cst_89 = arith.constant 1.000000e+00 : f32
    %310 = vector.broadcast %cst_89 : f32 to vector<2x32xf32>
    %311 = arith.addf %310, %309 : vector<2x32xf32>
    %312 = arith.divf %310, %311 : vector<2x32xf32>
    %313 = vector.extract_strided_slice %300 {offsets = [0, 64], sizes = [2, 32], strides = [1, 1]} : vector<2x128xf32> to vector<2x32xf32>
    %314 = math.tanh %313 : vector<2x32xf32>
    %315 = vector.extract_strided_slice %300 {offsets = [0, 96], sizes = [2, 32], strides = [1, 1]} : vector<2x128xf32> to vector<2x32xf32>
    %316 = arith.negf %315 : vector<2x32xf32>
    %317 = math.exp %316 : vector<2x32xf32>
    %cst_90 = arith.constant 1.000000e+00 : f32
    %318 = vector.broadcast %cst_90 : f32 to vector<2x32xf32>
    %319 = arith.addf %318, %317 : vector<2x32xf32>
    %320 = arith.divf %318, %319 : vector<2x32xf32>
    %321 = arith.mulf %312, %294 : vector<2x32xf32>
    %322 = arith.mulf %306, %314 : vector<2x32xf32>
    %323 = arith.addf %321, %322 : vector<2x32xf32>
    %324 = math.tanh %323 : vector<2x32xf32>
    %325 = arith.mulf %320, %324 : vector<2x32xf32>
    %c2_91 = arith.constant 2 : index
    %c0_92 = arith.constant 0 : index
    %326 = vector.load %arg11[%c2_91, %c0_92] : memref<16x32xf32, #tpu.memory_space<vmem>>, vector<2x32xf32>
    tpu.vector_store %arg11[%c2_91, %c0_92], %325 {strides = array<i32>} : memref<16x32xf32, #tpu.memory_space<vmem>>, vector<2x32xf32>,
    %327 = vector.extract_strided_slice %264 {offsets = [4, 0], sizes = [2, 128], strides = [1, 1]} : vector<16x128xf32> to vector<2x128xf32>
    %cst_93 = arith.constant dense<0.000000e+00> : vector<2x128xf32>
    %328 = tpu.matmul %325, %266, %cst_93 {dimension_numbers = #tpu.dot_dimension_numbers<[1], [0], [0], [1], [0, 0, 1, 1], [], []>} : vector<2x32xf32>, vector<32x128xf32>, vector<2x128xf32> -> vector<2x128xf32>
    %329 = arith.addf %327, %328 : vector<2x128xf32>
    %330 = vector.extract_strided_slice %329 {offsets = [0, 0], sizes = [2, 32], strides = [1, 1]} : vector<2x128xf32> to vector<2x32xf32>
    %331 = arith.negf %330 : vector<2x32xf32>
    %332 = math.exp %331 : vector<2x32xf32>
    %cst_94 = arith.constant 1.000000e+00 : f32
    %333 = vector.broadcast %cst_94 : f32 to vector<2x32xf32>
    %334 = arith.addf %333, %332 : vector<2x32xf32>
    %335 = arith.divf %333, %334 : vector<2x32xf32>
    %336 = vector.extract_strided_slice %329 {offsets = [0, 32], sizes = [2, 32], strides = [1, 1]} : vector<2x128xf32> to vector<2x32xf32>
    %337 = arith.negf %336 : vector<2x32xf32>
    %338 = math.exp %337 : vector<2x32xf32>
    %cst_95 = arith.constant 1.000000e+00 : f32
    %339 = vector.broadcast %cst_95 : f32 to vector<2x32xf32>
    %340 = arith.addf %339, %338 : vector<2x32xf32>
    %341 = arith.divf %339, %340 : vector<2x32xf32>
    %342 = vector.extract_strided_slice %329 {offsets = [0, 64], sizes = [2, 32], strides = [1, 1]} : vector<2x128xf32> to vector<2x32xf32>
    %343 = math.tanh %342 : vector<2x32xf32>
    %344 = vector.extract_strided_slice %329 {offsets = [0, 96], sizes = [2, 32], strides = [1, 1]} : vector<2x128xf32> to vector<2x32xf32>
    %345 = arith.negf %344 : vector<2x32xf32>
    %346 = math.exp %345 : vector<2x32xf32>
    %cst_96 = arith.constant 1.000000e+00 : f32
    %347 = vector.broadcast %cst_96 : f32 to vector<2x32xf32>
    %348 = arith.addf %347, %346 : vector<2x32xf32>
    %349 = arith.divf %347, %348 : vector<2x32xf32>
    %350 = arith.mulf %341, %323 : vector<2x32xf32>
    %351 = arith.mulf %335, %343 : vector<2x32xf32>
    %352 = arith.addf %350, %351 : vector<2x32xf32>
    %353 = math.tanh %352 : vector<2x32xf32>
    %354 = arith.mulf %349, %353 : vector<2x32xf32>
    %c4_97 = arith.constant 4 : index
    %c0_98 = arith.constant 0 : index
    %355 = vector.load %arg11[%c4_97, %c0_98] : memref<16x32xf32, #tpu.memory_space<vmem>>, vector<2x32xf32>
    tpu.vector_store %arg11[%c4_97, %c0_98], %354 {strides = array<i32>} : memref<16x32xf32, #tpu.memory_space<vmem>>, vector<2x32xf32>,
    %356 = vector.extract_strided_slice %264 {offsets = [6, 0], sizes = [2, 128], strides = [1, 1]} : vector<16x128xf32> to vector<2x128xf32>
    %cst_99 = arith.constant dense<0.000000e+00> : vector<2x128xf32>
    %357 = tpu.matmul %354, %266, %cst_99 {dimension_numbers = #tpu.dot_dimension_numbers<[1], [0], [0], [1], [0, 0, 1, 1], [], []>} : vector<2x32xf32>, vector<32x128xf32>, vector<2x128xf32> -> vector<2x128xf32>
    %358 = arith.addf %356, %357 : vector<2x128xf32>
    %359 = vector.extract_strided_slice %358 {offsets = [0, 0], sizes = [2, 32], strides = [1, 1]} : vector<2x128xf32> to vector<2x32xf32>
    %360 = arith.negf %359 : vector<2x32xf32>
    %361 = math.exp %360 : vector<2x32xf32>
    %cst_100 = arith.constant 1.000000e+00 : f32
    %362 = vector.broadcast %cst_100 : f32 to vector<2x32xf32>
    %363 = arith.addf %362, %361 : vector<2x32xf32>
    %364 = arith.divf %362, %363 : vector<2x32xf32>
    %365 = vector.extract_strided_slice %358 {offsets = [0, 32], sizes = [2, 32], strides = [1, 1]} : vector<2x128xf32> to vector<2x32xf32>
    %366 = arith.negf %365 : vector<2x32xf32>
    %367 = math.exp %366 : vector<2x32xf32>
    %cst_101 = arith.constant 1.000000e+00 : f32
    %368 = vector.broadcast %cst_101 : f32 to vector<2x32xf32>
    %369 = arith.addf %368, %367 : vector<2x32xf32>
    %370 = arith.divf %368, %369 : vector<2x32xf32>
    %371 = vector.extract_strided_slice %358 {offsets = [0, 64], sizes = [2, 32], strides = [1, 1]} : vector<2x128xf32> to vector<2x32xf32>
    %372 = math.tanh %371 : vector<2x32xf32>
    %373 = vector.extract_strided_slice %358 {offsets = [0, 96], sizes = [2, 32], strides = [1, 1]} : vector<2x128xf32> to vector<2x32xf32>
    %374 = arith.negf %373 : vector<2x32xf32>
    %375 = math.exp %374 : vector<2x32xf32>
    %cst_102 = arith.constant 1.000000e+00 : f32
    %376 = vector.broadcast %cst_102 : f32 to vector<2x32xf32>
    %377 = arith.addf %376, %375 : vector<2x32xf32>
    %378 = arith.divf %376, %377 : vector<2x32xf32>
    %379 = arith.mulf %370, %352 : vector<2x32xf32>
    %380 = arith.mulf %364, %372 : vector<2x32xf32>
    %381 = arith.addf %379, %380 : vector<2x32xf32>
    %382 = math.tanh %381 : vector<2x32xf32>
    %383 = arith.mulf %378, %382 : vector<2x32xf32>
    %c6_103 = arith.constant 6 : index
    %c0_104 = arith.constant 0 : index
    %384 = vector.load %arg11[%c6_103, %c0_104] : memref<16x32xf32, #tpu.memory_space<vmem>>, vector<2x32xf32>
    tpu.vector_store %arg11[%c6_103, %c0_104], %383 {strides = array<i32>} : memref<16x32xf32, #tpu.memory_space<vmem>>, vector<2x32xf32>,
    %385 = vector.extract_strided_slice %264 {offsets = [8, 0], sizes = [2, 128], strides = [1, 1]} : vector<16x128xf32> to vector<2x128xf32>
    %cst_105 = arith.constant dense<0.000000e+00> : vector<2x128xf32>
    %386 = tpu.matmul %383, %266, %cst_105 {dimension_numbers = #tpu.dot_dimension_numbers<[1], [0], [0], [1], [0, 0, 1, 1], [], []>} : vector<2x32xf32>, vector<32x128xf32>, vector<2x128xf32> -> vector<2x128xf32>
    %387 = arith.addf %385, %386 : vector<2x128xf32>
    %388 = vector.extract_strided_slice %387 {offsets = [0, 0], sizes = [2, 32], strides = [1, 1]} : vector<2x128xf32> to vector<2x32xf32>
    %389 = arith.negf %388 : vector<2x32xf32>
    %390 = math.exp %389 : vector<2x32xf32>
    %cst_106 = arith.constant 1.000000e+00 : f32
    %391 = vector.broadcast %cst_106 : f32 to vector<2x32xf32>
    %392 = arith.addf %391, %390 : vector<2x32xf32>
    %393 = arith.divf %391, %392 : vector<2x32xf32>
    %394 = vector.extract_strided_slice %387 {offsets = [0, 32], sizes = [2, 32], strides = [1, 1]} : vector<2x128xf32> to vector<2x32xf32>
    %395 = arith.negf %394 : vector<2x32xf32>
    %396 = math.exp %395 : vector<2x32xf32>
    %cst_107 = arith.constant 1.000000e+00 : f32
    %397 = vector.broadcast %cst_107 : f32 to vector<2x32xf32>
    %398 = arith.addf %397, %396 : vector<2x32xf32>
    %399 = arith.divf %397, %398 : vector<2x32xf32>
    %400 = vector.extract_strided_slice %387 {offsets = [0, 64], sizes = [2, 32], strides = [1, 1]} : vector<2x128xf32> to vector<2x32xf32>
    %401 = math.tanh %400 : vector<2x32xf32>
    %402 = vector.extract_strided_slice %387 {offsets = [0, 96], sizes = [2, 32], strides = [1, 1]} : vector<2x128xf32> to vector<2x32xf32>
    %403 = arith.negf %402 : vector<2x32xf32>
    %404 = math.exp %403 : vector<2x32xf32>
    %cst_108 = arith.constant 1.000000e+00 : f32
    %405 = vector.broadcast %cst_108 : f32 to vector<2x32xf32>
    %406 = arith.addf %405, %404 : vector<2x32xf32>
    %407 = arith.divf %405, %406 : vector<2x32xf32>
    %408 = arith.mulf %399, %381 : vector<2x32xf32>
    %409 = arith.mulf %393, %401 : vector<2x32xf32>
    %410 = arith.addf %408, %409 : vector<2x32xf32>
    %411 = math.tanh %410 : vector<2x32xf32>
    %412 = arith.mulf %407, %411 : vector<2x32xf32>
    %c8_109 = arith.constant 8 : index
    %c0_110 = arith.constant 0 : index
    %413 = vector.load %arg11[%c8_109, %c0_110] : memref<16x32xf32, #tpu.memory_space<vmem>>, vector<2x32xf32>
    tpu.vector_store %arg11[%c8_109, %c0_110], %412 {strides = array<i32>} : memref<16x32xf32, #tpu.memory_space<vmem>>, vector<2x32xf32>,
    %414 = vector.extract_strided_slice %264 {offsets = [10, 0], sizes = [2, 128], strides = [1, 1]} : vector<16x128xf32> to vector<2x128xf32>
    %cst_111 = arith.constant dense<0.000000e+00> : vector<2x128xf32>
    %415 = tpu.matmul %412, %266, %cst_111 {dimension_numbers = #tpu.dot_dimension_numbers<[1], [0], [0], [1], [0, 0, 1, 1], [], []>} : vector<2x32xf32>, vector<32x128xf32>, vector<2x128xf32> -> vector<2x128xf32>
    %416 = arith.addf %414, %415 : vector<2x128xf32>
    %417 = vector.extract_strided_slice %416 {offsets = [0, 0], sizes = [2, 32], strides = [1, 1]} : vector<2x128xf32> to vector<2x32xf32>
    %418 = arith.negf %417 : vector<2x32xf32>
    %419 = math.exp %418 : vector<2x32xf32>
    %cst_112 = arith.constant 1.000000e+00 : f32
    %420 = vector.broadcast %cst_112 : f32 to vector<2x32xf32>
    %421 = arith.addf %420, %419 : vector<2x32xf32>
    %422 = arith.divf %420, %421 : vector<2x32xf32>
    %423 = vector.extract_strided_slice %416 {offsets = [0, 32], sizes = [2, 32], strides = [1, 1]} : vector<2x128xf32> to vector<2x32xf32>
    %424 = arith.negf %423 : vector<2x32xf32>
    %425 = math.exp %424 : vector<2x32xf32>
    %cst_113 = arith.constant 1.000000e+00 : f32
    %426 = vector.broadcast %cst_113 : f32 to vector<2x32xf32>
    %427 = arith.addf %426, %425 : vector<2x32xf32>
    %428 = arith.divf %426, %427 : vector<2x32xf32>
    %429 = vector.extract_strided_slice %416 {offsets = [0, 64], sizes = [2, 32], strides = [1, 1]} : vector<2x128xf32> to vector<2x32xf32>
    %430 = math.tanh %429 : vector<2x32xf32>
    %431 = vector.extract_strided_slice %416 {offsets = [0, 96], sizes = [2, 32], strides = [1, 1]} : vector<2x128xf32> to vector<2x32xf32>
    %432 = arith.negf %431 : vector<2x32xf32>
    %433 = math.exp %432 : vector<2x32xf32>
    %cst_114 = arith.constant 1.000000e+00 : f32
    %434 = vector.broadcast %cst_114 : f32 to vector<2x32xf32>
    %435 = arith.addf %434, %433 : vector<2x32xf32>
    %436 = arith.divf %434, %435 : vector<2x32xf32>
    %437 = arith.mulf %428, %410 : vector<2x32xf32>
    %438 = arith.mulf %422, %430 : vector<2x32xf32>
    %439 = arith.addf %437, %438 : vector<2x32xf32>
    %440 = math.tanh %439 : vector<2x32xf32>
    %441 = arith.mulf %436, %440 : vector<2x32xf32>
    %c10_115 = arith.constant 10 : index
    %c0_116 = arith.constant 0 : index
    %442 = vector.load %arg11[%c10_115, %c0_116] : memref<16x32xf32, #tpu.memory_space<vmem>>, vector<2x32xf32>
    tpu.vector_store %arg11[%c10_115, %c0_116], %441 {strides = array<i32>} : memref<16x32xf32, #tpu.memory_space<vmem>>, vector<2x32xf32>,
    %443 = vector.extract_strided_slice %264 {offsets = [12, 0], sizes = [2, 128], strides = [1, 1]} : vector<16x128xf32> to vector<2x128xf32>
    %cst_117 = arith.constant dense<0.000000e+00> : vector<2x128xf32>
    %444 = tpu.matmul %441, %266, %cst_117 {dimension_numbers = #tpu.dot_dimension_numbers<[1], [0], [0], [1], [0, 0, 1, 1], [], []>} : vector<2x32xf32>, vector<32x128xf32>, vector<2x128xf32> -> vector<2x128xf32>
    %445 = arith.addf %443, %444 : vector<2x128xf32>
    %446 = vector.extract_strided_slice %445 {offsets = [0, 0], sizes = [2, 32], strides = [1, 1]} : vector<2x128xf32> to vector<2x32xf32>
    %447 = arith.negf %446 : vector<2x32xf32>
    %448 = math.exp %447 : vector<2x32xf32>
    %cst_118 = arith.constant 1.000000e+00 : f32
    %449 = vector.broadcast %cst_118 : f32 to vector<2x32xf32>
    %450 = arith.addf %449, %448 : vector<2x32xf32>
    %451 = arith.divf %449, %450 : vector<2x32xf32>
    %452 = vector.extract_strided_slice %445 {offsets = [0, 32], sizes = [2, 32], strides = [1, 1]} : vector<2x128xf32> to vector<2x32xf32>
    %453 = arith.negf %452 : vector<2x32xf32>
    %454 = math.exp %453 : vector<2x32xf32>
    %cst_119 = arith.constant 1.000000e+00 : f32
    %455 = vector.broadcast %cst_119 : f32 to vector<2x32xf32>
    %456 = arith.addf %455, %454 : vector<2x32xf32>
    %457 = arith.divf %455, %456 : vector<2x32xf32>
    %458 = vector.extract_strided_slice %445 {offsets = [0, 64], sizes = [2, 32], strides = [1, 1]} : vector<2x128xf32> to vector<2x32xf32>
    %459 = math.tanh %458 : vector<2x32xf32>
    %460 = vector.extract_strided_slice %445 {offsets = [0, 96], sizes = [2, 32], strides = [1, 1]} : vector<2x128xf32> to vector<2x32xf32>
    %461 = arith.negf %460 : vector<2x32xf32>
    %462 = math.exp %461 : vector<2x32xf32>
    %cst_120 = arith.constant 1.000000e+00 : f32
    %463 = vector.broadcast %cst_120 : f32 to vector<2x32xf32>
    %464 = arith.addf %463, %462 : vector<2x32xf32>
    %465 = arith.divf %463, %464 : vector<2x32xf32>
    %466 = arith.mulf %457, %439 : vector<2x32xf32>
    %467 = arith.mulf %451, %459 : vector<2x32xf32>
    %468 = arith.addf %466, %467 : vector<2x32xf32>
    %469 = math.tanh %468 : vector<2x32xf32>
    %470 = arith.mulf %465, %469 : vector<2x32xf32>
    %c12_121 = arith.constant 12 : index
    %c0_122 = arith.constant 0 : index
    %471 = vector.load %arg11[%c12_121, %c0_122] : memref<16x32xf32, #tpu.memory_space<vmem>>, vector<2x32xf32>
    tpu.vector_store %arg11[%c12_121, %c0_122], %470 {strides = array<i32>} : memref<16x32xf32, #tpu.memory_space<vmem>>, vector<2x32xf32>,
    %472 = vector.extract_strided_slice %264 {offsets = [14, 0], sizes = [2, 128], strides = [1, 1]} : vector<16x128xf32> to vector<2x128xf32>
    %cst_123 = arith.constant dense<0.000000e+00> : vector<2x128xf32>
    %473 = tpu.matmul %470, %266, %cst_123 {dimension_numbers = #tpu.dot_dimension_numbers<[1], [0], [0], [1], [0, 0, 1, 1], [], []>} : vector<2x32xf32>, vector<32x128xf32>, vector<2x128xf32> -> vector<2x128xf32>
    %474 = arith.addf %472, %473 : vector<2x128xf32>
    %475 = vector.extract_strided_slice %474 {offsets = [0, 0], sizes = [2, 32], strides = [1, 1]} : vector<2x128xf32> to vector<2x32xf32>
    %476 = arith.negf %475 : vector<2x32xf32>
    %477 = math.exp %476 : vector<2x32xf32>
    %cst_124 = arith.constant 1.000000e+00 : f32
    %478 = vector.broadcast %cst_124 : f32 to vector<2x32xf32>
    %479 = arith.addf %478, %477 : vector<2x32xf32>
    %480 = arith.divf %478, %479 : vector<2x32xf32>
    %481 = vector.extract_strided_slice %474 {offsets = [0, 32], sizes = [2, 32], strides = [1, 1]} : vector<2x128xf32> to vector<2x32xf32>
    %482 = arith.negf %481 : vector<2x32xf32>
    %483 = math.exp %482 : vector<2x32xf32>
    %cst_125 = arith.constant 1.000000e+00 : f32
    %484 = vector.broadcast %cst_125 : f32 to vector<2x32xf32>
    %485 = arith.addf %484, %483 : vector<2x32xf32>
    %486 = arith.divf %484, %485 : vector<2x32xf32>
    %487 = vector.extract_strided_slice %474 {offsets = [0, 64], sizes = [2, 32], strides = [1, 1]} : vector<2x128xf32> to vector<2x32xf32>
    %488 = math.tanh %487 : vector<2x32xf32>
    %489 = vector.extract_strided_slice %474 {offsets = [0, 96], sizes = [2, 32], strides = [1, 1]} : vector<2x128xf32> to vector<2x32xf32>
    %490 = arith.negf %489 : vector<2x32xf32>
    %491 = math.exp %490 : vector<2x32xf32>
    %cst_126 = arith.constant 1.000000e+00 : f32
    %492 = vector.broadcast %cst_126 : f32 to vector<2x32xf32>
    %493 = arith.addf %492, %491 : vector<2x32xf32>
    %494 = arith.divf %492, %493 : vector<2x32xf32>
    %495 = arith.mulf %486, %468 : vector<2x32xf32>
    %496 = arith.mulf %480, %488 : vector<2x32xf32>
    %497 = arith.addf %495, %496 : vector<2x32xf32>
    %498 = math.tanh %497 : vector<2x32xf32>
    %499 = arith.mulf %494, %498 : vector<2x32xf32>
    %c14_127 = arith.constant 14 : index
    %c0_128 = arith.constant 0 : index
    %500 = vector.load %arg11[%c14_127, %c0_128] : memref<16x32xf32, #tpu.memory_space<vmem>>, vector<2x32xf32>
    tpu.vector_store %arg11[%c14_127, %c0_128], %499 {strides = array<i32>} : memref<16x32xf32, #tpu.memory_space<vmem>>, vector<2x32xf32>,
    %c1_129 = arith.constant 1 : index
    %c0_130 = arith.constant 0 : index
    %c0_131 = arith.constant 0 : index
    %501 = vector.load %arg9[%c1_129, %c0_130, %c0_131] : memref<2x2x32xf32, #tpu.memory_space<vmem>>, vector<1x2x32xf32>
    %502 = vector.shape_cast %501 : vector<1x2x32xf32> to vector<2x32xf32>
    %503 = vector.shape_cast %499 : vector<2x32xf32> to vector<1x2x32xf32>
    tpu.vector_store %arg9[%c1_129, %c0_130, %c0_131], %503 {strides = array<i32>} : memref<2x2x32xf32, #tpu.memory_space<vmem>>, vector<1x2x32xf32>,
    %c1_132 = arith.constant 1 : index
    %c0_133 = arith.constant 0 : index
    %c0_134 = arith.constant 0 : index
    %504 = vector.load %arg10[%c1_132, %c0_133, %c0_134] : memref<2x2x32xf32, #tpu.memory_space<vmem>>, vector<1x2x32xf32>
    %505 = vector.shape_cast %504 : vector<1x2x32xf32> to vector<2x32xf32>
    %506 = vector.shape_cast %497 : vector<2x32xf32> to vector<1x2x32xf32>
    tpu.vector_store %arg10[%c1_132, %c0_133, %c0_134], %506 {strides = array<i32>} : memref<2x2x32xf32, #tpu.memory_space<vmem>>, vector<1x2x32xf32>,
    %c0_135 = arith.constant 0 : index
    %c0_136 = arith.constant 0 : index
    %507 = vector.load %arg6[%c0_135, %c0_136] : memref<32x4xf32, #tpu.memory_space<vmem>>, vector<32x4xf32>
    %cst_137 = arith.constant dense<0.000000e+00> : vector<2x4xf32>
    %508 = tpu.matmul %499, %507, %cst_137 {dimension_numbers = #tpu.dot_dimension_numbers<[1], [0], [0], [1], [0, 0, 1, 1], [], []>} : vector<2x32xf32>, vector<32x4xf32>, vector<2x4xf32> -> vector<2x4xf32>
    %c0_138 = arith.constant 0 : index
    %c0_139 = arith.constant 0 : index
    %509 = vector.load %arg7[%c0_138, %c0_139] : memref<1x4xf32, #tpu.memory_space<vmem>>, vector<1x4xf32>
    %510 = vector.broadcast %509 : vector<1x4xf32> to vector<2x4xf32>
    %511 = arith.addf %508, %510 : vector<2x4xf32>
    %c0_140 = arith.constant 0 : index
    %c0_141 = arith.constant 0 : index
    %512 = vector.load %arg8[%c0_140, %c0_141] : memref<2x4xf32, #tpu.memory_space<vmem>>, vector<2x4xf32>
    tpu.vector_store %arg8[%c0_140, %c0_141], %511 {strides = array<i32>} : memref<2x4xf32, #tpu.memory_space<vmem>>, vector<2x4xf32>,
    return
  }
}

</mosaic_0001>

<bundles_post_ra>
// kernel: recurrent_forward.1
= control target key start
LH: loop header
LB: loop body
LE: loop exit
PB: predicated region body
PF: predicated region fallthrough
CT: control target
= control target key end

     0   :  { %vm43_vm0 = vcmask 64512   ;;  %s3233_s0 = inlined_call_operand.vmem [shape: f32[16,8], index: 0, kind: input, shape index: {}]   ;;  %s3234_s1 = inlined_call_operand.vmem [shape: f32[8,32], index: 1, kind: input, shape index: {}]   ;;  %s3235_s2 = inlined_call_operand.vmem [shape: f32[1,32], index: 2, kind: input, shape index: {}]   ;;  %s3236_s3 = inlined_call_operand.vmem [shape: f32[2,32,128], index: 3, kind: input, shape index: {}]   ;;  %s3237_s4 = inlined_call_operand.vmem [shape: f32[2,32,128], index: 4, kind: input, shape index: {}]   ;;  %s3238_s5 = inlined_call_operand.vmem [shape: f32[2,1,128], index: 5, kind: input, shape index: {}]   ;;  %s3239_s6 = inlined_call_operand.vmem [shape: f32[32,4], index: 6, kind: input, shape index: {}]   ;;  %s3240_s7 = inlined_call_operand.vmem [shape: f32[1,4], index: 7, kind: input, shape index: {}]   ;;  %s3241_s8 = inlined_call_operand.hbm [shape: f32[2,4], index: 8, kind: output, shape index: {0}]   ;;  %s3242_s9 = inlined_call_operand.vmem [shape: f32[2,2,32], index: 9, kind: output, shape index: {1}]   ;;  %s3243_s10 = inlined_call_operand.vmem [shape: f32[2,2,32], index: 10, kind: output, shape index: {2}]  }
   0x1   :  { %v35_v0 = vld [vmem:[%s3234_s1] sm:$0xff]  ;;  %v34_v2 = vld [vmem:[%s3233_s0 + $0x8] sm:$0xff] }
   0x2   :  { %v33_v1 = vld [vmem:[%s3233_s0] sm:$0xff]  ;;  %2346 = vmatprep.subr.mxu0 %v35_v0 }
   0x3   :  { %2348 = vmatprep.mubr.msk.f32.mxu0 %vm43_vm0, %v33_v1 }
   0x4   :  { %16 = vsyncpa [#allocation4], 0  ;;  %2347 = vmatpush3.msra.mxu0 %v35_v0  ;;  %v133_v3 = vld [vmem:[%s3236_s3 + $0x18] sm:$0xff]  ;;  %v132_v4 = vld [vmem:[%s3236_s3 + $0x10] sm:$0xff]  ;;  %v2716_v6 = vmov 0.0   ;;  %vm2717_vm1 = vmmov 0  }
   0x5   :  { %2349 = vmatmul.mubr.msk.f32.vlgmr.msra.gmra.mxu0 %vm43_vm0, %v34_v2  ;;  %v2795_v5 = vld [vmem:[%s3237_s4 + $0x18] sm:$0xff]  ;;  %2351 = vmatprep.subr.mxu1 %v133_v3  ;;  %v2801_v7 = vld [vmem:[%s3237_s4 + $0x10] sm:$0xff]  ;;  %v131_v8 = vld [vmem:[%s3236_s3 + $0x8] sm:$0xff]  ;;  %vm125_vm2 = vcmask 261120   ;;  %s2718_s16 = smov 64   ;;  %s2719_s17 = smov 32  }
   0x6   :  { %2362 = vmatprep.subr.mxu0 %v2716_v6  ;;  %2352 = vmatpush3.msra.mxu1 %v133_v3  ;;  %v130_v9 = vld [vmem:[%s3236_s3] sm:$0xff]  ;;  %v2816_v10 = vld [vmem:[%s3237_s4 + $0x8] sm:$0xff]  ;;  %vm328_vm3 = vcmask 254976   ;;  %vm437_vm4 = vcmask 257026   ;;  %vm661_vm5 = vcmask 261126   ;;  %vm549_vm6 = vcmask 259076  }
   0x7   :  { %2363 = vmatpush3.msra.mxu0 %v2795_v5  ;;  %2353 = vmatprep.subr.mxu1 %v132_v4  ;;  %v2823_v11 = vld [vmem:[%s3237_s4] sm:$0xff]  ;;  %s2721_s25 = smov [#allocation3]   ;;  %vm2170_vm7 = vcmask 25600  }
   0x8   :  { %2364 = vmatprep.subr.mxu0 %v2716_v6  ;;  %2354 = vmatpush3.msra.mxu1 %v132_v4  ;;  %v2194_v12 = vld [vmem:[%s3235_s2] ss:$0 sm:$0xff]  ;;  %s2178_s26 = sshll.u32 %s2721_s25, 4  ;;  %s2179_s26 = int_to_ptr.vmem [resolvable:$true] %s2178_s26 }
   0x9   :  { %2365 = vmatpush3.msra.mxu0 %v2801_v7  ;;  %2355 = vmatprep.subr.mxu1 %v131_v8  ;;  %v2197_v21 = vld [vmem:[%s3238_s5] ss:$0 sm:$0xff]  ;;  %s2694_s27 = scalar_lea.vmem %s2179_s26, 32  ;;  %p2699_p1 = scmp.lt.s32.totalorder %s2179_s26, %s2179_s26 }
   0xa   :  { %2366 = vmatprep.subr.mxu0 %v2716_v6  ;;  %2356 = vmatpush3.msra.mxu1 %v131_v8  ;;  %p2695_p0 = scmp.ne.s32.totalorder %s2179_s26, %s2694_s27  ;;  %p2700_p2 = scmp.lt.s32.totalorder %s2694_s27, %s2694_s27 }
   0xb   :  { %2357 = vmatprep.subr.mxu1 %v130_v9  ;;  %2367 = vmatpush3.msra.mxu0 %v2816_v10 }
   0xc   :  { %2358 = vmatpush3.msra.mxu1 %v130_v9  ;;  %2368 = vmatprep.subr.mxu0 %v2716_v6  ;;  %p2701_p3 = por %p2700_p2, %p2699_p1 }
   0xd   :  { %2373 = vmatprep.subr.mxu1 %v2716_v6  ;;  %2369 = vmatpush3.msra.mxu0 %v2823_v11 }
   0xe   :  { %2370 = vmatprep.mubr.msk.f32.mxu0 %vm2717_vm1, %v2716_v6  ;;  %2384 = vmatprep.subr.mxu0 %v2716_v6  ;;  %p2702_p4 = pnand %p2701_p3, %p2695_p0 }
   0xf   :  { %2371 = vmatmul.mubr.f32.vlgmr.msra.gmra.mxu0 %v2716_v6 }
  0x10   :  { %2385 = vmatpush3.msra.mxu0 %v2795_v5  ;;  %2392 = vmatprep.mubr.msk.f32.mxu0 %vm2717_vm1, %v2716_v6 }
  0x11   :  { %2386 = vmatprep.subr.mxu0 %v2716_v6 }
  0x12   :  { %2387 = vmatpush3.msra.mxu0 %v2801_v7 }
  0x13   :  { %2388 = vmatprep.subr.mxu0 %v2716_v6 }
  0x14   :  { %2389 = vmatpush3.msra.mxu0 %v2816_v10 }
  0x15   :  { %2390 = vmatprep.subr.mxu0 %v2716_v6 }
  0x16   :  { %2391 = vmatpush3.msra.mxu0 %v2823_v11 }
  0x17   :  { %2406 = vmatprep.subr.mxu0 %v2716_v6 }
  0xc5   :  { %v2350_v13 = vpop.f32.mrf.mxu0 }
  0xc6   :  { %v122_v14 = vadd.f32 %v2350_v13, %v2194_v12 }
  0xc7   :  { %v116_v15 = vpop.f32.mrf.mxu0 }
  0xc8   :  { %127 = vst.msk [vmem:[#allocation2 + $0x8] sm:$0xff] %vm125_vm2, %v122_v14  ;;  %v117_v16 = vadd.f32 %v2194_v12, %v116_v15 }
  0xca   :  { %126 = vst.msk [vmem:[#allocation2] sm:$0xff] %vm125_vm2, %v117_v16 }
  0xcf   :  { %v129_v18 = vld [vmem:[#allocation2 + $0x8] sm:$0xff]  ;;  %v295_v19 = vpop.f32.mrf.mxu0 }
  0xd1   :  { %v128_v17 = vld [vmem:[#allocation2] sm:$0xff]  ;;  %v2372_v20 = vpop.f32.mrf.mxu0 }
  0xd2   :  { %2359 = vmatprep.mubr.msk.f32.mxu1 %vm125_vm2, %v128_v17 }
  0xd3   :  { %2360 = vmatmul.mubr.msk.f32.vlgmr.msra.gmra.mxu1 %vm125_vm2, %v129_v18 }
  0xd4   :  { %2374 = vmatpush3.msra.mxu1 %v2795_v5  ;;  %2381 = vmatprep.mubr.msk.f32.mxu1 %vm2717_vm1, %v2716_v6 }
  0xd5   :  { %2375 = vmatprep.subr.mxu1 %v2716_v6 }
  0xd6   :  { %2376 = vmatpush3.msra.mxu1 %v2801_v7 }
  0xd7   :  { %2377 = vmatprep.subr.mxu1 %v2716_v6 }
  0xd8   :  { %2378 = vmatpush3.msra.mxu1 %v2816_v10 }
  0xd9   :  { %2379 = vmatprep.subr.mxu1 %v2716_v6 }
  0xda   :  { %2380 = vmatpush3.msra.mxu1 %v2823_v11 }
  0xdb   :  { %2395 = vmatprep.subr.mxu1 %v2716_v6 }
 0x193   :  { %v2361_v22 = vpop.f32.mrf.mxu1 }
 0x194   :  { %v2861_v23 = vadd.f32 %v2361_v22, %v2197_v21 }
 0x195   :  { %v213_v24 = vpop.f32.mrf.mxu1 }
 0x196   :  { %v2863_v25 = vadd.f32 %v2197_v21, %v213_v24 }
 0x198   :  { %v299_v26 = vadd.f32 %v295_v19, %v2863_v25 }
 0x19a   :  { %2566 = vtanh.f32 %v299_v26  ;;  %v2200_v28 = vmul.f32 -1.442695, %v299_v26 }
 0x19c   :  { %2568 = vpow2.f32 %v2200_v28 }
 0x1a7   :  { %v2567_v27 = vpop.eup %2566 }
 0x1a8   :  { %309 = vrot.lane.b32.xlu0 %v2567_v27, %s2718_s16 }
 0x1a9   :  { %v2569_v29 = vpop.eup %2568 }
 0x1aa   :  { %v303_v30 = vadd.f32 1.0, %v2569_v29 }
 0x1ac   :  { %2570 = vrcp.f32 %v303_v30 }
 0x1b9   :  { %v2571_v31 = vpop.eup %2570 }
 0x1ba   :  { %v307_v34 = vmul.f32 0.0, %v2571_v31 }
 0x21a   :  { %v310_v32 = vpop.permute.xlu0 %309 }
 0x21b   :  { %v312_v33 = vmul.f32 %v2571_v31, %v310_v32 }
 0x21d   :  { %314 = vrot.lane.b32.xlu0 %v312_v33, %s2719_s17 }
 0x28f   :  { %v315_v35 = vpop.permute.xlu0 %314 }
 0x290   :  { %v317_v36 = vadd.f32 %v315_v35, %v307_v34 }
 0x292   :  { %2572 = vtanh.f32 %v317_v36  ;;  %v414_v52 = vrot.slane %v317_v36, 6 }
 0x29f   :  { %v2573_v37 = vpop.eup %2572 }
 0x2a0   :  { %320 = vrot.lane.b32.xlu1 %v2573_v37, %s2718_s16 }
 0x312   :  { %v321_v38 = vpop.permute.xlu1 %320 }
 0x313   :  { %v323_v39 = vmul.f32 %v2571_v31, %v321_v38 }
 0x315   :  { %325 = vrot.lane.b32.xlu1 %v323_v39, %s2719_s17 }
 0x387   :  { %v326_v40 = vpop.permute.xlu1 %325 }
 0x388   :  { %329 = vst.msk [vmem:[#allocation2] sm:$0x3] %vm328_vm3, %v326_v40  ;;  %2382 = vmatmul.mubr.msk.f32.vlgmr.msra.gmra.mxu1 %vm125_vm2, %v326_v40 }
 0x389   :  { %2396 = vmatpush3.msra.mxu1 %v2795_v5  ;;  %2403 = vmatprep.mubr.msk.f32.mxu1 %vm2717_vm1, %v2716_v6 }
 0x38a   :  { %2397 = vmatprep.subr.mxu1 %v2716_v6 }
 0x38b   :  { %2398 = vmatpush3.msra.mxu1 %v2801_v7 }
 0x38c   :  { %2399 = vmatprep.subr.mxu1 %v2716_v6 }
 0x38d   :  { %2400 = vmatpush3.msra.mxu1 %v2816_v10 }
 0x38e   :  { %2401 = vmatprep.subr.mxu1 %v2716_v6 }
 0x38f   :  { %2402 = vmatpush3.msra.mxu1 %v2823_v11 }
 0x390   :  { %2417 = vmatprep.subr.mxu1 %v2716_v6 }
 0x448   :  { %v398_v41 = vpop.f32.mrf.mxu1 }
 0x449   :  { %v403_v42 = vrot.slane %v398_v41, 6 }
 0x44a   :  { %v2383_v43 = vpop.f32.mrf.mxu1 }
 0x44b   :  { %v405_v44 = vadd.f32 %v403_v42, %v2863_v25 }
 0x44d   :  { %2574 = vtanh.f32 %v405_v44  ;;  %v2202_v46 = vmul.f32 -1.442695, %v405_v44 }
 0x44f   :  { %2576 = vpow2.f32 %v2202_v46 }
 0x45a   :  { %v2575_v45 = vpop.eup %2574 }
 0x45b   :  { %418 = vrot.lane.b32.xlu0 %v2575_v45, %s2718_s16 }
 0x45c   :  { %v2577_v47 = vpop.eup %2576 }
 0x45d   :  { %v409_v48 = vadd.f32 1.0, %v2577_v47 }
 0x45f   :  { %2578 = vrcp.f32 %v409_v48 }
 0x46c   :  { %v2579_v49 = vpop.eup %2578 }
 0x46d   :  { %v416_v53 = vmul.f32 %v2579_v49, %v414_v52 }
 0x4cd   :  { %v419_v50 = vpop.permute.xlu0 %418 }
 0x4ce   :  { %v421_v51 = vmul.f32 %v2579_v49, %v419_v50 }
 0x4d0   :  { %423 = vrot.lane.b32.xlu1 %v421_v51, %s2719_s17 }
 0x542   :  { %v424_v54 = vpop.permute.xlu1 %423 }
 0x543   :  { %v426_v55 = vadd.f32 %v424_v54, %v416_v53 }
 0x545   :  { %2580 = vtanh.f32 %v426_v55  ;;  %v526_v13 = vrot.slane %v426_v55, 6 }
 0x552   :  { %v2581_v56 = vpop.eup %2580 }
 0x553   :  { %429 = vrot.lane.b32.xlu0 %v2581_v56, %s2718_s16 }
 0x5c5   :  { %v430_v57 = vpop.permute.xlu0 %429 }
 0x5c6   :  { %v2886_v58 = vmul.f32 %v2579_v49, %v430_v57 }
 0x5c8   :  { %v439_v59 = vrot.slane %v2886_v58, 2 }
 0x5ca   :  { %440 = vrot.lane.b32.xlu1 %v439_v59, %s2719_s17 }
 0x63c   :  { %v441_v60 = vpop.permute.xlu1 %440 }
 0x63d   :  { %2393 = vmatmul.mubr.msk.f32.vlgmr.msra.gmra.mxu0 %vm125_vm2, %v441_v60 }
 0x63e   :  { %2407 = vmatpush3.msra.mxu0 %v2795_v5  ;;  %2414 = vmatprep.mubr.msk.f32.mxu0 %vm2717_vm1, %v2716_v6 }
 0x63f   :  { %2408 = vmatprep.subr.mxu0 %v2716_v6 }
 0x640   :  { %2409 = vmatpush3.msra.mxu0 %v2801_v7 }
 0x641   :  { %2410 = vmatprep.subr.mxu0 %v2716_v6 }
 0x642   :  { %2411 = vmatpush3.msra.mxu0 %v2816_v10 }
 0x643   :  { %2412 = vmatprep.subr.mxu0 %v2716_v6 }
 0x644   :  { %2413 = vmatpush3.msra.mxu0 %v2823_v11 }
 0x645   :  { %2428 = vmatprep.subr.mxu0 %v2716_v6 }
 0x6fd   :  { %v510_v61 = vpop.f32.mrf.mxu0 }
 0x6fe   :  { %v515_v62 = vrot.slane %v510_v61, 4 }
 0x6ff   :  { %v2394_v63 = vpop.f32.mrf.mxu0 }
 0x700   :  { %v517_v0 = vadd.f32 %v515_v62, %v2863_v25 }
 0x702   :  { %2582 = vtanh.f32 %v517_v0  ;;  %v2204_v2 = vmul.f32 -1.442695, %v517_v0 }
 0x704   :  { %2584 = vpow2.f32 %v2204_v2 }
 0x70f   :  { %v2583_v1 = vpop.eup %2582 }
 0x710   :  { %530 = vrot.lane.b32.xlu0 %v2583_v1, %s2718_s16 }
 0x711   :  { %v2585_v3 = vpop.eup %2584 }
 0x712   :  { %v521_v4 = vadd.f32 1.0, %v2585_v3 }
 0x714   :  { %2586 = vrcp.f32 %v521_v4 }
 0x721   :  { %v2587_v8 = vpop.eup %2586 }
 0x722   :  { %v528_v14 = vmul.f32 %v2587_v8, %v526_v13 }
 0x782   :  { %v531_v9 = vpop.permute.xlu0 %530 }
 0x783   :  { %v533_v12 = vmul.f32 %v2587_v8, %v531_v9 }
 0x785   :  { %535 = vrot.lane.b32.xlu1 %v533_v12, %s2719_s17 }
 0x7f7   :  { %v536_v15 = vpop.permute.xlu1 %535 }
 0x7f8   :  { %v538_v16 = vadd.f32 %v536_v15, %v528_v14 }
 0x7fa   :  { %2588 = vtanh.f32 %v538_v16  ;;  %v638_v35 = vrot.slane %v538_v16, 6 }
 0x807   :  { %v2589_v17 = vpop.eup %2588 }
 0x808   :  { %541 = vrot.lane.b32.xlu0 %v2589_v17, %s2718_s16 }
 0x87a   :  { %v542_v18 = vpop.permute.xlu0 %541 }
 0x87b   :  { %v2905_v19 = vmul.f32 %v2587_v8, %v542_v18 }
 0x87d   :  { %v551_v20 = vrot.slane %v2905_v19, 4 }
 0x87f   :  { %552 = vrot.lane.b32.xlu1 %v551_v20, %s2719_s17 }
 0x8f1   :  { %v553_v21 = vpop.permute.xlu1 %552 }
 0x8f2   :  { %2404 = vmatmul.mubr.msk.f32.vlgmr.msra.gmra.mxu1 %vm125_vm2, %v553_v21 }
 0x8f3   :  { %2418 = vmatpush3.msra.mxu1 %v2795_v5  ;;  %2425 = vmatprep.mubr.msk.f32.mxu1 %vm2717_vm1, %v2716_v6 }
 0x8f4   :  { %2419 = vmatprep.subr.mxu1 %v2716_v6 }
 0x8f5   :  { %2420 = vmatpush3.msra.mxu1 %v2801_v7 }
 0x8f6   :  { %2421 = vmatprep.subr.mxu1 %v2716_v6 }
 0x8f7   :  { %2422 = vmatpush3.msra.mxu1 %v2816_v10 }
 0x8f8   :  { %2423 = vmatprep.subr.mxu1 %v2716_v6 }
 0x8f9   :  { %2424 = vmatpush3.msra.mxu1 %v2823_v11 }
 0x8fa   :  { %2439 = vmatprep.subr.mxu1 %v2716_v6 }
 0x9b2   :  { %v622_v22 = vpop.f32.mrf.mxu1 }
 0x9b3   :  { %v627_v24 = vrot.slane %v622_v22, 2 }
 0x9b4   :  { %v2405_v26 = vpop.f32.mrf.mxu1 }
 0x9b5   :  { %v629_v27 = vadd.f32 %v627_v24, %v2863_v25 }
 0x9b7   :  { %2590 = vtanh.f32 %v629_v27  ;;  %v2206_v29 = vmul.f32 -1.442695, %v629_v27 }
 0x9b9   :  { %2592 = vpow2.f32 %v2206_v29 }
 0x9c4   :  { %v2591_v28 = vpop.eup %2590 }
 0x9c5   :  { %642 = vrot.lane.b32.xlu0 %v2591_v28, %s2718_s16 }
 0x9c6   :  { %v2593_v30 = vpop.eup %2592 }
 0x9c7   :  { %v633_v31 = vadd.f32 1.0, %v2593_v30 }
 0x9c9   :  { %2594 = vrcp.f32 %v633_v31 }
 0x9d6   :  { %v2595_v32 = vpop.eup %2594 }
 0x9d7   :  { %v640_v36 = vmul.f32 %v2595_v32, %v638_v35 }
 0xa37   :  { %v643_v33 = vpop.permute.xlu0 %642 }
 0xa38   :  { %v645_v34 = vmul.f32 %v2595_v32, %v643_v33 }
 0xa3a   :  { %647 = vrot.lane.b32.xlu1 %v645_v34, %s2719_s17 }
 0xaac   :  { %v648_v37 = vpop.permute.xlu1 %647 }
 0xaad   :  { %v650_v38 = vadd.f32 %v648_v37, %v640_v36 }
 0xaaf   :  { %2596 = vtanh.f32 %v650_v38  ;;  %v747_v53 = vrot.slane %v650_v38, 6 }
 0xabc   :  { %v2597_v25 = vpop.eup %2596 }
 0xabd   :  { %653 = vrot.lane.b32.xlu0 %v2597_v25, %s2718_s16 }
 0xb2f   :  { %v654_v39 = vpop.permute.xlu0 %653 }
 0xb30   :  { %v2924_v40 = vmul.f32 %v2595_v32, %v654_v39 }
 0xb32   :  { %v663_v41 = vrot.slane %v2924_v40, 6 }
 0xb34   :  { %664 = vrot.lane.b32.xlu1 %v663_v41, %s2719_s17 }
 0xba6   :  { %v665_v42 = vpop.permute.xlu1 %664 }
 0xba7   :  { %2415 = vmatmul.mubr.msk.f32.vlgmr.msra.gmra.mxu0 %vm125_vm2, %v665_v42 }
 0xba8   :  { %2429 = vmatpush3.msra.mxu0 %v2795_v5  ;;  %2436 = vmatprep.mubr.msk.f32.mxu0 %vm2717_vm1, %v2716_v6 }
 0xba9   :  { %2430 = vmatprep.subr.mxu0 %v2716_v6 }
 0xbaa   :  { %2431 = vmatpush3.msra.mxu0 %v2801_v7 }
 0xbab   :  { %2432 = vmatprep.subr.mxu0 %v2716_v6 }
 0xbac   :  { %2433 = vmatpush3.msra.mxu0 %v2816_v10 }
 0xbad   :  { %2434 = vmatprep.subr.mxu0 %v2716_v6 }
 0xbae   :  { %2435 = vmatpush3.msra.mxu0 %v2823_v11 }
 0xc67   :  { %v734_v43 = vpop.f32.mrf.mxu0 }
 0xc68   :  { %v738_v44 = vadd.f32 %v734_v43, %v2861_v23 }
 0xc69   :  { %v2416_v45 = vpop.f32.mrf.mxu0 }
 0xc6a   :  { %2598 = vtanh.f32 %v738_v44  ;;  %v2208_v47 = vmul.f32 -1.442695, %v738_v44 }
 0xc6c   :  { %2600 = vpow2.f32 %v2208_v47 }
 0xc77   :  { %v2599_v46 = vpop.eup %2598 }
 0xc78   :  { %751 = vrot.lane.b32.xlu0 %v2599_v46, %s2718_s16 }
 0xc79   :  { %v2601_v48 = vpop.eup %2600 }
 0xc7a   :  { %v742_v49 = vadd.f32 1.0, %v2601_v48 }
 0xc7c   :  { %2602 = vrcp.f32 %v742_v49 }
 0xc89   :  { %v2603_v50 = vpop.eup %2602 }
 0xc8a   :  { %v749_v54 = vmul.f32 %v2603_v50, %v747_v53 }
 0xcea   :  { %v752_v51 = vpop.permute.xlu0 %751 }
 0xceb   :  { %v754_v52 = vmul.f32 %v2603_v50, %v752_v51 }
 0xced   :  { %756 = vrot.lane.b32.xlu1 %v754_v52, %s2719_s17 }
 0xd5f   :  { %v757_v55 = vpop.permute.xlu1 %756 }
 0xd60   :  { %v759_v56 = vadd.f32 %v757_v55, %v749_v54 }
 0xd62   :  { %2604 = vtanh.f32 %v759_v56 }
 0xd6f   :  { %v2605_v57 = vpop.eup %2604 }
 0xd70   :  { %762 = vrot.lane.b32.xlu0 %v2605_v57, %s2718_s16 }
 0xde2   :  { %v763_v59 = vpop.permute.xlu0 %762 }
 0xde3   :  { %v765_v60 = vmul.f32 %v2603_v50, %v763_v59  ;;  %v2218_v59 = vld [vmem:[%s3236_s3 + $0x38] sm:$0xff] }
 0xde4   :  { %2450 = vmatprep.subr.mxu0 %v2218_v59 }
 0xde5   :  { %767 = vrot.lane.b32.xlu1 %v765_v60, %s2719_s17  ;;  %v2217_v60 = vld [vmem:[%s3236_s3 + $0x30] sm:$0xff] }
 0xe57   :  { %v768_v61 = vpop.permute.xlu1 %767 }
 0xe58   :  { %770 = vst.msk [vmem:[#allocation2 + $0x8] sm:$0x3] %vm328_vm3, %v768_v61  ;;  %2426 = vmatmul.mubr.msk.f32.vlgmr.msra.gmra.mxu1 %vm125_vm2, %v768_v61  ;;  %v3000_v61 = vld [vmem:[%s3237_s4 + $0x38] sm:$0xff] }
 0xe59   :  { %2440 = vmatpush3.msra.mxu1 %v2795_v5  ;;  %2447 = vmatprep.mubr.msk.f32.mxu1 %vm2717_vm1, %v2716_v6 }
 0xe5a   :  { %2441 = vmatprep.subr.mxu1 %v2716_v6 }
 0xe5b   :  { %2442 = vmatpush3.msra.mxu1 %v2801_v7 }
 0xe5c   :  { %2443 = vmatprep.subr.mxu1 %v2716_v6 }
 0xe5d   :  { %2444 = vmatpush3.msra.mxu1 %v2816_v10 }
 0xe5e   :  { %2445 = vmatprep.subr.mxu1 %v2716_v6 }
 0xe5f   :  { %2446 = vmatpush3.msra.mxu1 %v2823_v11  ;;  %v855_v11 = vrot.slane %v759_v56, 6 }
 0xe60   :  { %2461 = vmatprep.subr.mxu1 %v2716_v6 }
 0xf18   :  { %v839_v62 = vpop.f32.mrf.mxu1 }
 0xf19   :  { %v844_v63 = vrot.slane %v839_v62, 6  ;;  %v3009_v62 = vld [vmem:[%s3237_s4 + $0x30] sm:$0xff] }
 0xf1a   :  { %v2427_v5 = vpop.f32.mrf.mxu1 }
 0xf1b   :  { %v846_v0 = vadd.f32 %v844_v63, %v2861_v23  ;;  %v3015_v63 = vld [vmem:[%s3237_s4 + $0x28] sm:$0xff]  ;;  %v2215_v5 = vld [vmem:[%s3236_s3 + $0x20] sm:$0xff] }
 0xf1d   :  { %2606 = vtanh.f32 %v846_v0  ;;  %v2210_v7 = vmul.f32 -1.442695, %v846_v0  ;;  %v3027_v0 = vld [vmem:[%s3237_s4 + $0x20] sm:$0xff] }
 0xf1f   :  { %2608 = vpow2.f32 %v2210_v7 }
 0xf2a   :  { %v2607_v1 = vpop.eup %2606 }
 0xf2b   :  { %859 = vrot.lane.b32.xlu0 %v2607_v1, %s2718_s16 }
 0xf2c   :  { %v2609_v2 = vpop.eup %2608 }
 0xf2d   :  { %v850_v3 = vadd.f32 1.0, %v2609_v2 }
 0xf2f   :  { %2610 = vrcp.f32 %v850_v3 }
 0xf3c   :  { %v2611_v10 = vpop.eup %2610 }
 0xf3d   :  { %v857_v9 = vmul.f32 %v2611_v10, %v855_v11 }
 0xf9d   :  { %v860_v4 = vpop.permute.xlu0 %859 }
 0xf9e   :  { %v862_v8 = vmul.f32 %v2611_v10, %v860_v4 }
 0xfa0   :  { %864 = vrot.lane.b32.xlu1 %v862_v8, %s2719_s17 }
0x1012   :  { %v865_v12 = vpop.permute.xlu1 %864 }
0x1013   :  { %v867_v13 = vadd.f32 %v865_v12, %v857_v9  ;;  %v2220_v12 = vld [vmem:[%s3238_s5 + $0x1] ss:$0 sm:$0xff]  ;;  %s2720_s5 = smov 96  }
0x1015   :  { %2612 = vtanh.f32 %v867_v13  ;;  %v966_v33 = vrot.slane %v867_v13, 6 }
0x1022   :  { %v2613_v14 = vpop.eup %2612 }
0x1023   :  { %870 = vrot.lane.b32.xlu0 %v2613_v14, %s2718_s16 }
0x1095   :  { %v871_v15 = vpop.permute.xlu0 %870 }
0x1096   :  { %v2959_v16 = vmul.f32 %v2611_v10, %v871_v15 }
0x1098   :  { %v879_v17 = vrot.slane %v2959_v16, 2 }
0x109a   :  { %880 = vrot.lane.b32.xlu1 %v879_v17, %s2719_s17 }
0x110c   :  { %v881_v18 = vpop.permute.xlu1 %880 }
0x110d   :  { %2437 = vmatmul.mubr.msk.f32.vlgmr.msra.gmra.mxu0 %vm125_vm2, %v881_v18 }
0x110e   :  { %2451 = vmatpush3.msra.mxu0 %v2218_v59 }
0x110f   :  { %2452 = vmatprep.subr.mxu0 %v2217_v60 }
0x1110   :  { %2453 = vmatpush3.msra.mxu0 %v2217_v60 }
0x11cd   :  { %v950_v20 = vpop.f32.mrf.mxu0 }
0x11ce   :  { %v955_v21 = vrot.slane %v950_v20, 4 }
0x11cf   :  { %v2438_v22 = vpop.f32.mrf.mxu0 }
0x11d0   :  { %v957_v24 = vadd.f32 %v955_v21, %v2861_v23 }
0x11d2   :  { %2614 = vtanh.f32 %v957_v24  ;;  %v2212_v27 = vmul.f32 -1.442695, %v957_v24 }
0x11d4   :  { %2616 = vpow2.f32 %v2212_v27 }
0x11df   :  { %v2615_v26 = vpop.eup %2614 }
0x11e0   :  { %970 = vrot.lane.b32.xlu0 %v2615_v26, %s2718_s16 }
0x11e1   :  { %v2617_v28 = vpop.eup %2616 }
0x11e2   :  { %v961_v29 = vadd.f32 1.0, %v2617_v28 }
0x11e4   :  { %2618 = vrcp.f32 %v961_v29 }
0x11f1   :  { %v2619_v30 = vpop.eup %2618 }
0x11f2   :  { %v968_v34 = vmul.f32 %v2619_v30, %v966_v33 }
0x1252   :  { %v971_v31 = vpop.permute.xlu0 %970 }
0x1253   :  { %v973_v32 = vmul.f32 %v2619_v30, %v971_v31 }
0x1255   :  { %975 = vrot.lane.b32.xlu1 %v973_v32, %s2719_s17 }
0x12c7   :  { %v976_v35 = vpop.permute.xlu1 %975 }
0x12c8   :  { %v978_v36 = vadd.f32 %v976_v35, %v968_v34 }
0x12ca   :  { %2620 = vtanh.f32 %v978_v36 }
0x12d7   :  { %v2621_v37 = vpop.eup %2620 }
0x12d8   :  { %981 = vrot.lane.b32.xlu0 %v2621_v37, %s2718_s16 }
0x134a   :  { %v982_v38 = vpop.permute.xlu0 %981 }
0x134b   :  { %v984_v25 = vmul.f32 %v2619_v30, %v982_v38 }
0x134d   :  { %v990_v39 = vrot.slane %v984_v25, 4 }
0x134f   :  { %991 = vrot.lane.b32.xlu1 %v990_v39, %s2719_s17 }
0x13c1   :  { %v992_v41 = vpop.permute.xlu1 %991 }
0x13c2   :  { %2448 = vmatmul.mubr.msk.f32.vlgmr.msra.gmra.mxu1 %vm125_vm2, %v992_v41 }
0x13c3   :  { %2469 = vmatprep.mubr.msk.f32.mxu1 %vm2717_vm1, %v2716_v6  ;;  %2462 = vmatpush3.msra.mxu1 %v3000_v61 }
0x13c4   :  { %2463 = vmatprep.subr.mxu1 %v2716_v6 }
0x13c5   :  { %2464 = vmatpush3.msra.mxu1 %v3009_v62 }
0x13c6   :  { %2465 = vmatprep.subr.mxu1 %v2716_v6 }
0x13c7   :  { %2466 = vmatpush3.msra.mxu1 %v3015_v63 }
0x13c8   :  { %2467 = vmatprep.subr.mxu1 %v2716_v6 }
0x13c9   :  { %2468 = vmatpush3.msra.mxu1 %v3027_v0 }
0x13ca   :  { %2470 = vmatmul.mubr.f32.vlgmr.msra.gmra.mxu1 %v2716_v6  ;;  %2483 = vmatprep.subr.mxu1 %v2716_v6 }
0x13cb   :  { %2484 = vmatpush3.msra.mxu1 %v3000_v61  ;;  %2491 = vmatprep.mubr.msk.f32.mxu1 %vm2717_vm1, %v2716_v6 }
0x13cc   :  { %2485 = vmatprep.subr.mxu1 %v2716_v6 }
0x13cd   :  { %2486 = vmatpush3.msra.mxu1 %v3009_v62 }
0x13ce   :  { %2487 = vmatprep.subr.mxu1 %v2716_v6 }
0x13cf   :  { %2488 = vmatpush3.msra.mxu1 %v3015_v63 }
0x13d0   :  { %2489 = vmatprep.subr.mxu1 %v2716_v6 }
0x13d1   :  { %2490 = vmatpush3.msra.mxu1 %v3027_v0 }
0x13d2   :  { %2505 = vmatprep.subr.mxu1 %v2716_v6 }
0x1482   :  { %v1061_v42 = vpop.f32.mrf.mxu1 }
0x1483   :  { %v1066_v43 = vrot.slane %v1061_v42, 2 }
0x1484   :  { %v2449_v44 = vpop.f32.mrf.mxu1 }
0x1485   :  { %v1068_v45 = vadd.f32 %v1066_v43, %v2861_v23  ;;  %v1077_v23 = vrot.slane %v978_v36, 6 }
0x1487   :  { %2622 = vtanh.f32 %v1068_v45  ;;  %v2214_v47 = vmul.f32 -1.442695, %v1068_v45 }
0x1489   :  { %2624 = vpow2.f32 %v2214_v47 }
0x148a   :  { %v1274_v11 = vpop.f32.mrf.mxu1 }
0x148c   :  { %v2471_v9 = vpop.f32.mrf.mxu1 }
0x1494   :  { %v2623_v46 = vpop.eup %2622 }
0x1495   :  { %1081 = vrot.lane.b32.xlu0 %v2623_v46, %s2718_s16 }
0x1496   :  { %v2625_v48 = vpop.eup %2624 }
0x1497   :  { %v1072_v49 = vadd.f32 1.0, %v2625_v48 }
0x1499   :  { %2626 = vrcp.f32 %v1072_v49 }
0x14a6   :  { %v2627_v50 = vpop.eup %2626 }
0x14a7   :  { %v1079_v53 = vmul.f32 %v2627_v50, %v1077_v23 }
0x1507   :  { %v1082_v51 = vpop.permute.xlu0 %1081 }
0x1508   :  { %v1084_v52 = vmul.f32 %v2627_v50, %v1082_v51 }
0x150a   :  { %1086 = vrot.lane.b32.xlu1 %v1084_v52, %s2719_s17 }
0x150e   :  { %434 = vrot.lane.b32.xlu1 %v2886_v58, %s2719_s17 }
0x1512   :  { %658 = vrot.lane.b32.xlu1 %v2924_v40, %s2719_s17 }
0x1516   :  { %986 = vrot.lane.b32.xlu1 %v984_v25, %s2719_s17 }
0x157c   :  { %v1087_v54 = vpop.permute.xlu1 %1086 }
0x157d   :  { %v2980_v55 = vadd.f32 %v1087_v54, %v1079_v53 }
0x157f   :  { %2628 = vtanh.f32 %v2980_v55 }
0x1580   :  { %v435_v56 = vpop.permute.xlu1 %434 }
0x1581   :  { %438 = vst.msk [vmem:[#allocation2] sm:$0xc] %vm437_vm4, %v435_v56 }
0x1584   :  { %v659_v57 = vpop.permute.xlu1 %658 }
0x1585   :  { %662 = vst.msk [vmem:[#allocation2] sm:$0xc0] %vm661_vm5, %v659_v57 }
0x1588   :  { %v987_v58 = vpop.permute.xlu1 %986 }
0x1589   :  { %989 = vst.msk [vmem:[#allocation2 + $0x8] sm:$0x30] %vm549_vm6, %v987_v58 }
0x158c   :  { %v2629_v40 = vpop.eup %2628 }
0x158d   :  { %1092 = vrot.lane.b32.xlu0 %v2629_v40, %s2718_s16 }
0x1591   :  { %546 = vrot.lane.b32.xlu0 %v2905_v19, %s2719_s17  ;;  %v2216_v19 = vld [vmem:[%s3236_s3 + $0x28] sm:$0xff] }
0x1592   :  { %2454 = vmatprep.subr.mxu0 %v2216_v19 }
0x1593   :  { %2455 = vmatpush3.msra.mxu0 %v2216_v19 }
0x1594   :  { %2456 = vmatprep.subr.mxu0 %v2215_v5 }
0x1595   :  { %875 = vrot.lane.b32.xlu0 %v2959_v16, %s2719_s17  ;;  %2457 = vmatpush3.msra.mxu0 %v2215_v5 }
0x1596   :  { %2472 = vmatprep.subr.mxu0 %v2716_v6 }
0x15ff   :  { %v1093_v1 = vpop.permute.xlu0 %1092 }
0x1600   :  { %v1095_v7 = vmul.f32 %v2627_v50, %v1093_v1 }
0x1602   :  { %1097 = vrot.lane.b32.xlu0 %v1095_v7, %s2719_s17 }
0x1603   :  { %v547_v2 = vpop.permute.xlu0 %546 }
0x1604   :  { %550 = vst.msk [vmem:[#allocation2] sm:$0x30] %vm549_vm6, %v547_v2 }
0x1607   :  { %v876_v3 = vpop.permute.xlu0 %875 }
0x1608   :  { %878 = vst.msk [vmem:[#allocation2 + $0x8] sm:$0xc] %vm437_vm4, %v876_v3 }
0x160b   :  { %v1107_v10 = vld [vmem:[#allocation2] sm:$0xff] }
0x160c   :  { %2458 = vmatprep.mubr.msk.f32.mxu0 %vm125_vm2, %v1107_v10 }
0x1674   :  { %v1098_v4 = vpop.permute.xlu0 %1097 }
0x1675   :  { %1100 = vst.msk [vmem:[#allocation2 + $0x8] sm:$0xc0] %vm661_vm5, %v1098_v4  ;;  %1101 = vst.msk [vmem:[%s3242_s9 - $0x6] sm:$0xc0] %vm661_vm5, %v1098_v4 }
0x167c   :  { %v1108_v8 = vld [vmem:[#allocation2 + $0x8] sm:$0xff] }
0x167d   :  { %2459 = vmatmul.mubr.msk.f32.vlgmr.msra.gmra.mxu0 %vm125_vm2, %v1108_v8 }
0x167e   :  { %2473 = vmatpush3.msra.mxu0 %v3000_v61  ;;  %2480 = vmatprep.mubr.msk.f32.mxu0 %vm2717_vm1, %v2716_v6 }
0x167f   :  { %2474 = vmatprep.subr.mxu0 %v2716_v6 }
0x1680   :  { %2475 = vmatpush3.msra.mxu0 %v3009_v62 }
0x1681   :  { %2476 = vmatprep.subr.mxu0 %v2716_v6 }
0x1682   :  { %2477 = vmatpush3.msra.mxu0 %v3015_v63 }
0x1683   :  { %2478 = vmatprep.subr.mxu0 %v2716_v6 }
0x1684   :  { %2479 = vmatpush3.msra.mxu0 %v3027_v0 }
0x1685   :  { %2494 = vmatprep.subr.mxu0 %v2716_v6 }
0x173d   :  { %v2460_v13 = vpop.f32.mrf.mxu0 }
0x173e   :  { %v3066_v14 = vadd.f32 %v2460_v13, %v2220_v12 }
0x173f   :  { %v1194_v15 = vpop.f32.mrf.mxu0 }
0x1740   :  { %v3068_v16 = vadd.f32 %v2220_v12, %v1194_v15 }
0x1742   :  { %v1278_v17 = vadd.f32 %v1274_v11, %v3068_v16 }
0x1744   :  { %2630 = vtanh.f32 %v1278_v17  ;;  %v2227_v20 = vmul.f32 -1.442695, %v1278_v17 }
0x1746   :  { %2632 = vpow2.f32 %v2227_v20 }
0x1751   :  { %v2631_v18 = vpop.eup %2630 }
0x1752   :  { %1288 = vrot.lane.b32.xlu1 %v2631_v18, %s2718_s16 }
0x1753   :  { %v2633_v21 = vpop.eup %2632 }
0x1754   :  { %v1282_v22 = vadd.f32 1.0, %v2633_v21 }
0x1756   :  { %2634 = vrcp.f32 %v1282_v22 }
0x1763   :  { %v2635_v24 = vpop.eup %2634 }
0x1764   :  { %v1286_v28 = vmul.f32 0.0, %v2635_v24 }
0x17c4   :  { %v1289_v26 = vpop.permute.xlu1 %1288 }
0x17c5   :  { %v1291_v27 = vmul.f32 %v2635_v24, %v1289_v26 }
0x17c7   :  { %1293 = vrot.lane.b32.xlu0 %v1291_v27, %s2719_s17 }
0x1839   :  { %v1294_v29 = vpop.permute.xlu0 %1293 }
0x183a   :  { %v1296_v30 = vadd.f32 %v1294_v29, %v1286_v28 }
0x183c   :  { %2636 = vtanh.f32 %v1296_v30  ;;  %v1392_v46 = vrot.slane %v1296_v30, 6 }
0x1849   :  { %v2637_v31 = vpop.eup %2636 }
0x184a   :  { %1299 = vrot.lane.b32.xlu1 %v2637_v31, %s2718_s16 }
0x18bc   :  { %v1300_v32 = vpop.permute.xlu1 %1299 }
0x18bd   :  { %v1302_v33 = vmul.f32 %v2635_v24, %v1300_v32 }
0x18bf   :  { %1304 = vrot.lane.b32.xlu0 %v1302_v33, %s2719_s17 }
0x1931   :  { %v1305_v34 = vpop.permute.xlu0 %1304 }
0x1932   :  { %1307 = vst.msk [vmem:[#allocation2] sm:$0x3] %vm328_vm3, %v1305_v34  ;;  %2481 = vmatmul.mubr.msk.f32.vlgmr.msra.gmra.mxu0 %vm125_vm2, %v1305_v34 }
0x1933   :  { %2495 = vmatpush3.msra.mxu0 %v3000_v61  ;;  %2502 = vmatprep.mubr.msk.f32.mxu0 %vm2717_vm1, %v2716_v6 }
0x1934   :  { %2496 = vmatprep.subr.mxu0 %v2716_v6 }
0x1935   :  { %2497 = vmatpush3.msra.mxu0 %v3009_v62 }
0x1936   :  { %2498 = vmatprep.subr.mxu0 %v2716_v6 }
0x1937   :  { %2499 = vmatpush3.msra.mxu0 %v3015_v63 }
0x1938   :  { %2500 = vmatprep.subr.mxu0 %v2716_v6 }
0x1939   :  { %2501 = vmatpush3.msra.mxu0 %v3027_v0 }
0x193a   :  { %2516 = vmatprep.subr.mxu0 %v2716_v6 }
0x19f2   :  { %v1376_v35 = vpop.f32.mrf.mxu0 }
0x19f3   :  { %v1381_v36 = vrot.slane %v1376_v35, 6 }
0x19f4   :  { %v2482_v37 = vpop.f32.mrf.mxu0 }
0x19f5   :  { %v1383_v38 = vadd.f32 %v1381_v36, %v3068_v16 }
0x19f7   :  { %2638 = vtanh.f32 %v1383_v38  ;;  %v2229_v39 = vmul.f32 -1.442695, %v1383_v38 }
0x19f9   :  { %2640 = vpow2.f32 %v2229_v39 }
0x1a04   :  { %v2639_v25 = vpop.eup %2638 }
0x1a05   :  { %1396 = vrot.lane.b32.xlu1 %v2639_v25, %s2718_s16 }
0x1a06   :  { %v2641_v41 = vpop.eup %2640 }
0x1a07   :  { %v1387_v42 = vadd.f32 1.0, %v2641_v41 }
0x1a09   :  { %2642 = vrcp.f32 %v1387_v42 }
0x1a16   :  { %v2643_v43 = vpop.eup %2642 }
0x1a17   :  { %v1394_v47 = vmul.f32 %v2643_v43, %v1392_v46 }
0x1a77   :  { %v1397_v44 = vpop.permute.xlu1 %1396 }
0x1a78   :  { %v1399_v45 = vmul.f32 %v2643_v43, %v1397_v44 }
0x1a7a   :  { %1401 = vrot.lane.b32.xlu0 %v1399_v45, %s2719_s17 }
0x1aec   :  { %v1402_v48 = vpop.permute.xlu0 %1401 }
0x1aed   :  { %v1404_v49 = vadd.f32 %v1402_v48, %v1394_v47 }
0x1aef   :  { %2644 = vtanh.f32 %v1404_v49  ;;  %v1503_v2 = vrot.slane %v1404_v49, 6 }
0x1afc   :  { %v2645_v50 = vpop.eup %2644 }
0x1afd   :  { %1407 = vrot.lane.b32.xlu1 %v2645_v50, %s2718_s16 }
0x1b6f   :  { %v1408_v51 = vpop.permute.xlu1 %1407 }
0x1b70   :  { %v3091_v52 = vmul.f32 %v2643_v43, %v1408_v51 }
0x1b72   :  { %v1416_v23 = vrot.slane %v3091_v52, 2 }
0x1b74   :  { %1417 = vrot.lane.b32.xlu0 %v1416_v23, %s2719_s17 }
0x1be6   :  { %v1418_v53 = vpop.permute.xlu0 %1417 }
0x1be7   :  { %2492 = vmatmul.mubr.msk.f32.vlgmr.msra.gmra.mxu1 %vm125_vm2, %v1418_v53 }
0x1be8   :  { %2506 = vmatpush3.msra.mxu1 %v3000_v61  ;;  %2513 = vmatprep.mubr.msk.f32.mxu1 %vm2717_vm1, %v2716_v6 }
0x1be9   :  { %2507 = vmatprep.subr.mxu1 %v2716_v6 }
0x1bea   :  { %2508 = vmatpush3.msra.mxu1 %v3009_v62 }
0x1beb   :  { %2509 = vmatprep.subr.mxu1 %v2716_v6 }
0x1bec   :  { %2510 = vmatpush3.msra.mxu1 %v3015_v63 }
0x1bed   :  { %2511 = vmatprep.subr.mxu1 %v2716_v6 }
0x1bee   :  { %2512 = vmatpush3.msra.mxu1 %v3027_v0 }
0x1bef   :  { %2527 = vmatprep.subr.mxu1 %v2716_v6 }
0x1ca7   :  { %v1487_v54 = vpop.f32.mrf.mxu1 }
0x1ca8   :  { %v1492_v56 = vrot.slane %v1487_v54, 4 }
0x1ca9   :  { %v2493_v57 = vpop.f32.mrf.mxu1 }
0x1caa   :  { %v1494_v58 = vadd.f32 %v1492_v56, %v3068_v16 }
0x1cac   :  { %2646 = vtanh.f32 %v1494_v58  ;;  %v2231_v59 = vmul.f32 -1.442695, %v1494_v58 }
0x1cae   :  { %2648 = vpow2.f32 %v2231_v59 }
0x1cb9   :  { %v2647_v40 = vpop.eup %2646 }
0x1cba   :  { %1507 = vrot.lane.b32.xlu1 %v2647_v40, %s2718_s16 }
0x1cbb   :  { %v2649_v60 = vpop.eup %2648 }
0x1cbc   :  { %v1498_v19 = vadd.f32 1.0, %v2649_v60 }
0x1cbe   :  { %2650 = vrcp.f32 %v1498_v19 }
0x1ccb   :  { %v2651_v5 = vpop.eup %2650 }
0x1ccc   :  { %v1505_v3 = vmul.f32 %v2651_v5, %v1503_v2 }
0x1d2c   :  { %v1508_v1 = vpop.permute.xlu1 %1507 }
0x1d2d   :  { %v1510_v7 = vmul.f32 %v2651_v5, %v1508_v1 }
0x1d2f   :  { %1512 = vrot.lane.b32.xlu0 %v1510_v7, %s2719_s17 }
0x1da1   :  { %v1513_v10 = vpop.permute.xlu0 %1512 }
0x1da2   :  { %v1515_v4 = vadd.f32 %v1513_v10, %v1505_v3 }
0x1da4   :  { %2652 = vtanh.f32 %v1515_v4  ;;  %v1614_v30 = vrot.slane %v1515_v4, 6 }
0x1db1   :  { %v2653_v8 = vpop.eup %2652 }
0x1db2   :  { %1518 = vrot.lane.b32.xlu1 %v2653_v8, %s2718_s16 }
0x1e24   :  { %v1519_v11 = vpop.permute.xlu1 %1518 }
0x1e25   :  { %v3110_v9 = vmul.f32 %v2651_v5, %v1519_v11 }
0x1e27   :  { %v1527_v12 = vrot.slane %v3110_v9, 4 }
0x1e29   :  { %1528 = vrot.lane.b32.xlu0 %v1527_v12, %s2719_s17 }
0x1e9b   :  { %v1529_v13 = vpop.permute.xlu0 %1528 }
0x1e9c   :  { %2503 = vmatmul.mubr.msk.f32.vlgmr.msra.gmra.mxu0 %vm125_vm2, %v1529_v13 }
0x1e9d   :  { %2517 = vmatpush3.msra.mxu0 %v3000_v61  ;;  %2524 = vmatprep.mubr.msk.f32.mxu0 %vm2717_vm1, %v2716_v6 }
0x1e9e   :  { %2518 = vmatprep.subr.mxu0 %v2716_v6 }
0x1e9f   :  { %2519 = vmatpush3.msra.mxu0 %v3009_v62 }
0x1ea0   :  { %2520 = vmatprep.subr.mxu0 %v2716_v6 }
0x1ea1   :  { %2521 = vmatpush3.msra.mxu0 %v3015_v63 }
0x1ea2   :  { %2522 = vmatprep.subr.mxu0 %v2716_v6 }
0x1ea3   :  { %2523 = vmatpush3.msra.mxu0 %v3027_v0 }
0x1ea4   :  { %2538 = vmatprep.subr.mxu0 %v2716_v6 }
0x1f5c   :  { %v1598_v15 = vpop.f32.mrf.mxu0 }
0x1f5d   :  { %v1603_v17 = vrot.slane %v1598_v15, 2 }
0x1f5e   :  { %v2504_v18 = vpop.f32.mrf.mxu0 }
0x1f5f   :  { %v1605_v20 = vadd.f32 %v1603_v17, %v3068_v16 }
0x1f61   :  { %2654 = vtanh.f32 %v1605_v20  ;;  %v2233_v22 = vmul.f32 -1.442695, %v1605_v20 }
0x1f63   :  { %2656 = vpow2.f32 %v2233_v22 }
0x1f6e   :  { %v2655_v21 = vpop.eup %2654 }
0x1f6f   :  { %1618 = vrot.lane.b32.xlu1 %v2655_v21, %s2718_s16 }
0x1f70   :  { %v2657_v24 = vpop.eup %2656 }
0x1f71   :  { %v1609_v26 = vadd.f32 1.0, %v2657_v24 }
0x1f73   :  { %2658 = vrcp.f32 %v1609_v26 }
0x1f80   :  { %v2659_v27 = vpop.eup %2658 }
0x1f81   :  { %v1616_v31 = vmul.f32 %v2659_v27, %v1614_v30 }
0x1fe1   :  { %v1619_v28 = vpop.permute.xlu1 %1618 }
0x1fe2   :  { %v1621_v29 = vmul.f32 %v2659_v27, %v1619_v28 }
0x1fe4   :  { %1623 = vrot.lane.b32.xlu0 %v1621_v29, %s2719_s17 }
0x2056   :  { %v1624_v32 = vpop.permute.xlu0 %1623 }
0x2057   :  { %v1626_v33 = vadd.f32 %v1624_v32, %v1616_v31 }
0x2059   :  { %2660 = vtanh.f32 %v1626_v33  ;;  %v1722_v48 = vrot.slane %v1626_v33, 6 }
0x2066   :  { %v2661_v16 = vpop.eup %2660 }
0x2067   :  { %1629 = vrot.lane.b32.xlu1 %v2661_v16, %s2718_s16 }
0x20d9   :  { %v1630_v34 = vpop.permute.xlu1 %1629 }
0x20da   :  { %v3129_v35 = vmul.f32 %v2659_v27, %v1630_v34 }
0x20dc   :  { %v1638_v36 = vrot.slane %v3129_v35, 6 }
0x20de   :  { %1639 = vrot.lane.b32.xlu0 %v1638_v36, %s2719_s17 }
0x2150   :  { %v1640_v37 = vpop.permute.xlu0 %1639 }
0x2151   :  { %2514 = vmatmul.mubr.msk.f32.vlgmr.msra.gmra.mxu1 %vm125_vm2, %v1640_v37 }
0x2152   :  { %2528 = vmatpush3.msra.mxu1 %v3000_v61  ;;  %2535 = vmatprep.mubr.msk.f32.mxu1 %vm2717_vm1, %v2716_v6 }
0x2153   :  { %2529 = vmatprep.subr.mxu1 %v2716_v6 }
0x2154   :  { %2530 = vmatpush3.msra.mxu1 %v3009_v62 }
0x2155   :  { %2531 = vmatprep.subr.mxu1 %v2716_v6 }
0x2156   :  { %2532 = vmatpush3.msra.mxu1 %v3015_v63 }
0x2157   :  { %2533 = vmatprep.subr.mxu1 %v2716_v6 }
0x2158   :  { %2534 = vmatpush3.msra.mxu1 %v3027_v0 }
0x2159   :  { %2549 = vmatprep.subr.mxu1 %v2716_v6 }
0x2211   :  { %v1709_v38 = vpop.f32.mrf.mxu1 }
0x2212   :  { %v1713_v25 = vadd.f32 %v1709_v38, %v3066_v14 }
0x2213   :  { %v2515_v39 = vpop.f32.mrf.mxu1 }
0x2214   :  { %2662 = vtanh.f32 %v1713_v25  ;;  %v2235_v42 = vmul.f32 -1.442695, %v1713_v25 }
0x2216   :  { %2664 = vpow2.f32 %v2235_v42 }
0x2221   :  { %v2663_v41 = vpop.eup %2662 }
0x2222   :  { %1726 = vrot.lane.b32.xlu1 %v2663_v41, %s2718_s16 }
0x2223   :  { %v2665_v43 = vpop.eup %2664 }
0x2224   :  { %v1717_v44 = vadd.f32 1.0, %v2665_v43 }
0x2226   :  { %2666 = vrcp.f32 %v1717_v44 }
0x2233   :  { %v2667_v45 = vpop.eup %2666 }
0x2234   :  { %v1724_v49 = vmul.f32 %v2667_v45, %v1722_v48 }
0x2294   :  { %v1727_v46 = vpop.permute.xlu1 %1726 }
0x2295   :  { %v1729_v47 = vmul.f32 %v2667_v45, %v1727_v46 }
0x2297   :  { %1731 = vrot.lane.b32.xlu0 %v1729_v47, %s2719_s17 }
0x2309   :  { %v1732_v50 = vpop.permute.xlu0 %1731 }
0x230a   :  { %v1734_v51 = vadd.f32 %v1732_v50, %v1724_v49 }
0x230c   :  { %2668 = vtanh.f32 %v1734_v51 }
0x2319   :  { %v2669_v23 = vpop.eup %2668 }
0x231a   :  { %1737 = vrot.lane.b32.xlu1 %v2669_v23, %s2718_s16 }
0x238c   :  { %v1738_v53 = vpop.permute.xlu1 %1737 }
0x238d   :  { %v1740_v54 = vmul.f32 %v2667_v45, %v1738_v53  ;;  %v2087_v53 = vld [vmem:[%s3239_s6 + $0x18] sm:$0xff] }
0x238f   :  { %1742 = vrot.lane.b32.xlu0 %v1740_v54, %s2719_s17  ;;  %v2086_v54 = vld [vmem:[%s3239_s6 + $0x10] sm:$0xff] }
0x2401   :  { %v1743_v56 = vpop.permute.xlu0 %1742 }
0x2402   :  { %1745 = vst.msk [vmem:[#allocation2 + $0x8] sm:$0x3] %vm328_vm3, %v1743_v56  ;;  %2525 = vmatmul.mubr.msk.f32.vlgmr.msra.gmra.mxu0 %vm125_vm2, %v1743_v56  ;;  %v2085_v56 = vld [vmem:[%s3239_s6 + $0x8] sm:$0xff] }
0x2403   :  { %2539 = vmatpush3.msra.mxu0 %v3000_v61  ;;  %2546 = vmatprep.mubr.msk.f32.mxu0 %vm2717_vm1, %v2716_v6 }
0x2404   :  { %2540 = vmatprep.subr.mxu0 %v2716_v6 }
0x2405   :  { %2541 = vmatpush3.msra.mxu0 %v3009_v62 }
0x2406   :  { %2542 = vmatprep.subr.mxu0 %v2716_v6 }
0x2407   :  { %2543 = vmatpush3.msra.mxu0 %v3015_v63 }
0x2408   :  { %2544 = vmatprep.subr.mxu0 %v2716_v6 }
0x2409   :  { %2545 = vmatpush3.msra.mxu0 %v3027_v0  ;;  %v1830_v0 = vrot.slane %v1734_v51, 6 }
0x24c2   :  { %v1814_v57 = vpop.f32.mrf.mxu0 }
0x24c3   :  { %v1819_v58 = vrot.slane %v1814_v57, 6 }
0x24c4   :  { %v2526_v40 = vpop.f32.mrf.mxu0 }
0x24c5   :  { %v1821_v61 = vadd.f32 %v1819_v58, %v3066_v14 }
0x24c7   :  { %2670 = vtanh.f32 %v1821_v61  ;;  %v2237_v60 = vmul.f32 -1.442695, %v1821_v61 }
0x24c9   :  { %2672 = vpow2.f32 %v2237_v60 }
0x24d4   :  { %v2671_v59 = vpop.eup %2670 }
0x24d5   :  { %1834 = vrot.lane.b32.xlu1 %v2671_v59, %s2718_s16 }
0x24d6   :  { %v2673_v62 = vpop.eup %2672 }
0x24d7   :  { %v1825_v19 = vadd.f32 1.0, %v2673_v62 }
0x24d9   :  { %2674 = vrcp.f32 %v1825_v19 }
0x24e6   :  { %v2675_v5 = vpop.eup %2674 }
0x24e7   :  { %v1832_v7 = vmul.f32 %v2675_v5, %v1830_v0 }
0x2547   :  { %v1835_v63 = vpop.permute.xlu1 %1834 }
0x2548   :  { %v1837_v1 = vmul.f32 %v2675_v5, %v1835_v63 }
0x254a   :  { %1839 = vrot.lane.b32.xlu0 %v1837_v1, %s2719_s17 }
0x25bc   :  { %v1840_v2 = vpop.permute.xlu0 %1839 }
0x25bd   :  { %v1842_v3 = vadd.f32 %v1840_v2, %v1832_v7 }
0x25bf   :  { %2676 = vtanh.f32 %v1842_v3  ;;  %v1941_v29 = vrot.slane %v1842_v3, 6 }
0x25cc   :  { %v2677_v10 = vpop.eup %2676 }
0x25cd   :  { %1845 = vrot.lane.b32.xlu1 %v2677_v10, %s2718_s16 }
0x263f   :  { %v1846_v4 = vpop.permute.xlu1 %1845 }
0x2640   :  { %v3164_v8 = vmul.f32 %v2675_v5, %v1846_v4  ;;  %v2244_v5 = vld [vmem:[%s3240_s7] ss:$0 sm:$0xff] }
0x2642   :  { %v1854_v11 = vrot.slane %v3164_v8, 2 }
0x2644   :  { %1855 = vrot.lane.b32.xlu0 %v1854_v11, %s2719_s17 }
0x26b6   :  { %v1856_v12 = vpop.permute.xlu0 %1855 }
0x26b7   :  { %2536 = vmatmul.mubr.msk.f32.vlgmr.msra.gmra.mxu1 %vm125_vm2, %v1856_v12 }
0x26b8   :  { %2557 = vmatprep.mubr.msk.f32.mxu1 %vm2717_vm1, %v2716_v6  ;;  %2550 = vmatpush3.msra.mxu1 %v2087_v53 }
0x26b9   :  { %2551 = vmatprep.subr.mxu1 %v2716_v6 }
0x26ba   :  { %2552 = vmatpush3.msra.mxu1 %v2086_v54 }
0x26bb   :  { %2553 = vmatprep.subr.mxu1 %v2716_v6 }
0x26bc   :  { %2554 = vmatpush3.msra.mxu1 %v2085_v56 }
0x26bd   :  { %2555 = vmatprep.subr.mxu1 %v2716_v6 }
0x2777   :  { %v1925_v13 = vpop.f32.mrf.mxu1 }
0x2778   :  { %v1930_v15 = vrot.slane %v1925_v13, 4 }
0x2779   :  { %v2537_v17 = vpop.f32.mrf.mxu1 }
0x277a   :  { %v1932_v18 = vadd.f32 %v1930_v15, %v3066_v14 }
0x277c   :  { %2678 = vtanh.f32 %v1932_v18  ;;  %v2239_v21 = vmul.f32 -1.442695, %v1932_v18 }
0x277e   :  { %2680 = vpow2.f32 %v2239_v21 }
0x2789   :  { %v2679_v20 = vpop.eup %2678 }
0x278a   :  { %1945 = vrot.lane.b32.xlu1 %v2679_v20, %s2718_s16 }
0x278b   :  { %v2681_v22 = vpop.eup %2680 }
0x278c   :  { %v1936_v24 = vadd.f32 1.0, %v2681_v22 }
0x278e   :  { %2682 = vrcp.f32 %v1936_v24 }
0x279b   :  { %v2683_v26 = vpop.eup %2682 }
0x279c   :  { %v1943_v30 = vmul.f32 %v2683_v26, %v1941_v29 }
0x27fc   :  { %v1946_v27 = vpop.permute.xlu1 %1945 }
0x27fd   :  { %v1948_v28 = vmul.f32 %v2683_v26, %v1946_v27 }
0x27ff   :  { %1950 = vrot.lane.b32.xlu0 %v1948_v28, %s2719_s17 }
0x2871   :  { %v1951_v31 = vpop.permute.xlu0 %1950 }
0x2872   :  { %v1953_v32 = vadd.f32 %v1951_v31, %v1943_v30 }
0x2874   :  { %2684 = vtanh.f32 %v1953_v32  ;;  %v2052_v49 = vrot.slane %v1953_v32, 6 }
0x2881   :  { %v2685_v33 = vpop.eup %2684 }
0x2882   :  { %1956 = vrot.lane.b32.xlu1 %v2685_v33, %s2718_s16 }
0x28f4   :  { %v1957_v16 = vpop.permute.xlu1 %1956 }
0x28f5   :  { %v1959_v34 = vmul.f32 %v2683_v26, %v1957_v16 }
0x28f7   :  { %v1965_v36 = vrot.slane %v1959_v34, 4 }
0x28f9   :  { %1966 = vrot.lane.b32.xlu0 %v1965_v36, %s2719_s17 }
0x296b   :  { %v1967_v37 = vpop.permute.xlu0 %1966 }
0x296c   :  { %2547 = vmatmul.mubr.msk.f32.vlgmr.msra.gmra.mxu0 %vm125_vm2, %v1967_v37 }
0x2a2c   :  { %v2036_v38 = vpop.f32.mrf.mxu0 }
0x2a2d   :  { %v2041_v25 = vrot.slane %v2036_v38, 2 }
0x2a2e   :  { %v2548_v39 = vpop.f32.mrf.mxu0 }
0x2a2f   :  { %v2043_v41 = vadd.f32 %v2041_v25, %v3066_v14 }
0x2a31   :  { %2686 = vtanh.f32 %v2043_v41  ;;  %v2241_v43 = vmul.f32 -1.442695, %v2043_v41 }
0x2a33   :  { %2688 = vpow2.f32 %v2241_v43 }
0x2a3e   :  { %v2687_v42 = vpop.eup %2686 }
0x2a3f   :  { %2056 = vrot.lane.b32.xlu1 %v2687_v42, %s2718_s16 }
0x2a40   :  { %v2689_v44 = vpop.eup %2688 }
0x2a41   :  { %v2047_v45 = vadd.f32 1.0, %v2689_v44 }
0x2a43   :  { %2690 = vrcp.f32 %v2047_v45 }
0x2a50   :  { %v2691_v46 = vpop.eup %2690 }
0x2a51   :  { %v2054_v50 = vmul.f32 %v2691_v46, %v2052_v49 }
0x2ab1   :  { %v2057_v47 = vpop.permute.xlu1 %2056 }
0x2ab2   :  { %v2059_v48 = vmul.f32 %v2691_v46, %v2057_v47 }
0x2ab4   :  { %2061 = vrot.lane.b32.xlu0 %v2059_v48, %s2719_s17 }
0x2b26   :  { %v2062_v51 = vpop.permute.xlu0 %2061 }
0x2b27   :  { %v2064_v23 = vadd.f32 %v2062_v51, %v2054_v50 }
0x2b29   :  { %2692 = vtanh.f32 %v2064_v23 }
0x2b36   :  { %v2693_v14 = vpop.eup %2692 }
0x2b37   :  { %2067 = vrot.lane.b32.xlu1 %v2693_v14, %s2718_s16 }
0x2b3b   :  { %1103 = vrot.lane.b32.xlu1 %v2980_v55, %s2720_s5  ;;  %v2084_v55 = vld [vmem:[%s3239_s6] sm:$0xff] }
0x2b3c   :  { %2556 = vmatpush3.msra.mxu1 %v2084_v55 }
0x2b3f   :  { %1523 = vrot.lane.b32.xlu1 %v3110_v9, %s2719_s17 }
0x2b43   :  { %1850 = vrot.lane.b32.xlu1 %v3164_v8, %s2719_s17 }
0x2ba9   :  { %v2068_v9 = vpop.permute.xlu1 %2067 }
0x2baa   :  { %v2070_v57 = vmul.f32 %v2691_v46, %v2068_v9 }
0x2bac   :  { %v2095_v58 = vrot.slane %v2070_v57, 6  ;;  %2072 = vrot.lane.b32.xlu1 %v2070_v57, %s2719_s17 }
0x2bad   :  { %v1104_v40 = vpop.permute.xlu1 %1103 }
0x2bae   :  { %1106 = vst.msk [vmem:[%s3243_s10 - $0x6] sm:$0xc0] %vm661_vm5, %v1104_v40  ;;  %2096 = vrot.lane.b32.xlu0 %v2095_v58, %s2719_s17 }
0x2bb1   :  { %v1524_v61 = vpop.permute.xlu1 %1523 }
0x2bb2   :  { %1526 = vst.msk [vmem:[#allocation2] sm:$0x30] %vm549_vm6, %v1524_v61  ;;  %1412 = vrot.lane.b32.xlu0 %v3091_v52, %s2719_s17 }
0x2bb5   :  { %v1851_v6 = vpop.permute.xlu1 %1850 }
0x2bb6   :  { %1853 = vst.msk [vmem:[#allocation2 + $0x8] sm:$0xc] %vm437_vm4, %v1851_v6  ;;  %1634 = vrot.lane.b32.xlu0 %v3129_v35, %s2719_s17 }
0x2bba   :  { %1961 = vrot.lane.b32.xlu0 %v1959_v34, %s2719_s17 }
0x2bbe   :  { %2079 = vrot.lane.b32.xlu0 %v2064_v23, %s2720_s5 }
0x2c1e   :  { %v2073_v59 = vpop.permute.xlu1 %2072 }
0x2c1f   :  { %2075 = vst.msk [vmem:[#allocation2 + $0x8] sm:$0xc0] %vm661_vm5, %v2073_v59  ;;  %2242 = vst.msk [vmem:[%s3242_s9 - $0x4] sm:$0xc0] %vm661_vm5, %v2073_v59 }
0x2c20   :  { %v2097_v60 = vpop.permute.xlu0 %2096 }
0x2c21   :  { %2558 = vmatmul.mubr.msk.f32.vlgmr.msra.gmra.mxu1 %vm125_vm2, %v2097_v60 }
0x2c24   :  { %v1413_v52 = vpop.permute.xlu0 %1412 }
0x2c25   :  { %1415 = vst.msk [vmem:[#allocation2] sm:$0xc] %vm437_vm4, %v1413_v52 }
0x2c28   :  { %v1635_v62 = vpop.permute.xlu0 %1634 }
0x2c29   :  { %1637 = vst.msk [vmem:[#allocation2] sm:$0xc0] %vm661_vm5, %v1635_v62 }
0x2c2c   :  { %v1962_v35 = vpop.permute.xlu0 %1961 }
0x2c2d   :  { %1964 = vst.msk [vmem:[#allocation2 + $0x8] sm:$0x30] %vm549_vm6, %v1962_v35 }
0x2c30   :  { %v2080_v19 = vpop.permute.xlu0 %2079 }
0x2c31   :  { %2243 = vst.msk [vmem:[%s3243_s10 - $0x4] sm:$0xc0] %vm661_vm5, %v2080_v19 }
0x2ce1   :  { %v2166_v63 = vpop.f32.mrf.mxu1 }
0x2ce2   :  { %v2167_v1 = vadd.f32 %v2244_v5, %v2166_v63 }
0x2ce3   :  { %v2559_v0 = vpop.f32.mrf.mxu1 }
0x2ce4   :  { %2171 = vst.msk [vmem:[#allocation3] sm:$0x3] %vm2170_vm7, %v2167_v1 }
0x2ce5   :  { %2705 = shalt.err (!%p2702_p4)
}
0x2ce6   :  { %2181 = dma.vmem_to_hbm [thread:$0]  %s2179_s26, 32, %s3241_s8, [#allocation4]  }
0x2ce7   :  { %2714 = dma.done.wait [#allocation4], 32  }
0x2ce8   :  { %2715 = vsyncadd [#allocation4], 4294967264 }
0x2ce9   :  { %2193 = vsyncpa [#allocation4], 1 }

</bundles_post_ra>
